<compile_context>
chip_gen: v5e
topology: v5e:2x2
jax: 0.10.0
libtpu: 0.0.40
codegen_flags: <defaults>
</compile_context>

<pallas_src>
import functools

import jax
import jax.numpy as jnp
from jax.experimental import pallas as pl
from jax.experimental.pallas import tpu as pltpu


def mha_kernel(x_ref, wq_ref, bq_ref, wk_ref, bk_ref, wv_ref, bv_ref,
               wp_ref, bp_ref, o_ref, *, num_heads, kv_tile, fast_math):
    BB, N, E = x_ref.shape          # batch-block, seq, emb
    H = num_heads
    D = E // H
    G = BB * H                      # fused (batch, head) einsum batch dim
    T = kv_tile
    n_kv = N // T
    f32 = jnp.float32
    mm = jnp.bfloat16 if fast_math else f32   # MXU-input dtype

    # One cast of the activations; projections then run bf16 x bf16 -> f32 acc.
    x = x_ref[...].reshape(BB * N, E).astype(mm)

    # Hoisted bias reads (each (1, E)); one broadcasted f32 add each.
    bq = bq_ref[...]
    bk = bk_ref[...]
    bv = bv_ref[...]
    bp = bp_ref[...]

    # Q/K/V projections over all BB*N rows at once (large-M MXU matmuls).
    # NOTE: 1/sqrt(emb_size) is already folded into wq/bq (prepare_params).
    q = jnp.dot(x, wq_ref[...].astype(mm), preferred_element_type=f32) + bq
    k = jnp.dot(x, wk_ref[...].astype(mm), preferred_element_type=f32) + bk
    v = jnp.dot(x, wv_ref[...].astype(mm), preferred_element_type=f32) + bv

    # (BB*N, E) -> (BB, N, H, D) -> (BB, H, N, D) -> (G, N, D).
    # Cast to mm first so the relayout moves half the bytes under fast_math.
    def to_heads(t):
        return jnp.transpose(t.astype(mm).reshape(BB, N, H, D),
                             (0, 2, 1, 3)).reshape(G, N, D)

    qh = to_heads(q)
    kh = to_heads(k)
    vh = to_heads(v)

    # Head-batched QK^T / att@V on one KV tile (contraction expressed directly,
    # no materialized transpose of kh).
    def tile_scores(t):
        kt = kh[:, t * T:(t + 1) * T, :]
        return jnp.einsum('gqd,gkd->gqk', qh, kt,
                          preferred_element_type=f32)            # (G, N, T)

    def tile_ctx(p, t):
        vt = vh[:, t * T:(t + 1) * T, :]
        return jnp.einsum('gqk,gkd->gqd', p.astype(mm), vt,
                          preferred_element_type=f32)            # (G, N, D)

    # Online softmax over KV tiles: live set is (G, N, T), never (G, N, N).
    # Softmax elementwise math kept in f32 (portable to v5e, better accuracy).
    e0 = tile_scores(0)
    m_i = jnp.max(e0, axis=-1, keepdims=True)
    p0 = jnp.exp(e0 - m_i)
    l_i = jnp.sum(p0, axis=-1, keepdims=True)
    acc = tile_ctx(p0, 0)
    for t in range(1, n_kv):        # static, unrolled; single iteration body for small N
        et = tile_scores(t)
        m_new = jnp.maximum(m_i, jnp.max(et, axis=-1, keepdims=True))
        alpha = jnp.exp(m_i - m_new)
        pt = jnp.exp(et - m_new)
        l_i = alpha * l_i + jnp.sum(pt, axis=-1, keepdims=True)
        acc = alpha * acc + tile_ctx(pt, t)
        m_i = m_new

    # Softmax denominator via EUP reciprocal. att_drop: identity at inference.
    ctx = acc * pl.reciprocal(l_i, approx=fast_math)             # (G, N, D) f32

    # 'b h n d -> b n (h d)' (in mm dtype) and output projection over all rows.
    out = jnp.transpose(ctx.astype(mm).reshape(BB, H, N, D),
                        (0, 2, 1, 3)).reshape(BB * N, E)
    proj = jnp.dot(out, wp_ref[...].astype(mm), preferred_element_type=f32) + bp

    # Single store of the full (BB, N, E) block.
    o_ref[...] = proj.reshape(BB, N, E).astype(o_ref.dtype)


def _default_vmem_budget_bytes():
    """~0.5x physical VMEM (64 MiB on v5e/v6e, 32 MiB on v7x); safe fallback."""
    try:
        cap = int(pltpu.get_tpu_info().vmem_capacity_bytes)
    except Exception:
        cap = 64 * 1024 * 1024          # conservative (v7x per-core VMEM)
    return max(cap // 2, 16 * 1024 * 1024)


def _choose_kv_tile(N, max_tile=512):
    """Largest reasonable KV tile dividing N (full N when N <= max_tile)."""
    if N <= max_tile:
        return N
    for t in range(max_tile, 127, -1):
        if N % t == 0:
            return t
    return N


def _estimate_vmem_bytes(BB, N, E, H, kv_tile, fast_math):
    """Rough per-grid-step VMEM live set for the kernel above."""
    f32b = 4
    mmb = 2 if fast_math else 4
    weights = 4 * E * E * mmb + 4 * E * f32b            # single-buffered weights + biases
    io = 4 * BB * N * E * f32b                          # x + out, double-buffered
    qkv = 3 * BB * N * E * f32b                         # f32 projection outputs
    heads = 3 * BB * N * E * mmb                        # qh / kh / vh relayouts
    scores = 3 * BB * H * N * kv_tile * f32b            # per-tile energy / exp / cast
    run = BB * N * E * f32b + 2 * BB * H * N * f32b     # acc + (m, l)
    proj = 2 * BB * N * E * mmb + BB * N * E * f32b     # ctx relayout + proj
    return weights + io + qkv + heads + scores + run + proj


def _choose_batch_block(B, N, E, H, kv_tile, fast_math, budget):
    # Cap at B//2 so v7x megacore always has >= 2 parallel grid steps.
    cap = B // 2 if B >= 2 else 1
    best = 1
    for bb in range(1, cap + 1):
        if B % bb == 0 and _estimate_vmem_bytes(bb, N, E, H, kv_tile, fast_math) <= budget:
            best = bb
    return best


def prepare_params(params, emb_size, fast_math=False):
    """One-time host-side parameter prep.

    Folds the 1/sqrt(emb_size) energy scaling into the query Linear (wq, bq)
    and, under fast_math, stores the four weight matrices as bf16 so every
    grid step DMAs half the weight bytes. Biases stay f32.
    """
    scale = 1.0 / (emb_size ** 0.5)
    p = dict(params)
    p["wq"] = params["wq"] * scale
    p["bq"] = params["bq"] * scale
    if fast_math:
        for k in ("wq", "wk", "wv", "wp"):
            p[k] = p[k].astype(jnp.bfloat16)
    return p


def multi_head_attention(x, params, *, num_heads, batch_block=None, kv_tile=None,
                         fast_math=False, vmem_budget_bytes=None):
    """x: (B, N, E). params: prepared params (see prepare_params)."""
    B, N, E = x.shape
    assert E % num_heads == 0, "emb_size must be divisible by num_heads"

    if kv_tile is None:
        kv_tile = _choose_kv_tile(N)
    assert N % kv_tile == 0, "kv_tile must divide the sequence length"

    if vmem_budget_bytes is None:
        vmem_budget_bytes = _default_vmem_budget_bytes()

    if batch_block is None:
        batch_block = _choose_batch_block(B, N, E, num_heads, kv_tile,
                                          fast_math, vmem_budget_bytes)
    assert B % batch_block == 0, "batch_block must divide batch"
    grid = (B // batch_block,)

    kernel = functools.partial(mha_kernel, num_heads=num_heads,
                               kv_tile=kv_tile, fast_math=fast_math)
    x_spec = pl.BlockSpec((batch_block, N, E), lambda i: (i, 0, 0))

    def build(single_buffer_weights):
        if single_buffer_weights:
            # Constant index_map -> a second pipeline buffer is pure VMEM waste.
            w_spec = pl.BlockSpec((E, E), lambda i: (0, 0),
                                  pipeline_mode=pl.Buffered(1))
            b_spec = pl.BlockSpec((1, E), lambda i: (0, 0),
                                  pipeline_mode=pl.Buffered(1))
        else:
            w_spec = pl.BlockSpec((E, E), lambda i: (0, 0))
            b_spec = pl.BlockSpec((1, E), lambda i: (0, 0))
        return pl.pallas_call(
            kernel,
            out_shape=jax.ShapeDtypeStruct((B, N, E), x.dtype),
            grid_spec=pltpu.PrefetchScalarGridSpec(
                num_scalar_prefetch=0,
                grid=grid,
                in_specs=[
                    x_spec,
                    w_spec, b_spec,   # queries
                    w_spec, b_spec,   # keys
                    w_spec, b_spec,   # values
                    w_spec, b_spec,   # projection
                ],
                out_specs=x_spec,
            ),
            compiler_params=pltpu.CompilerParams(
                dimension_semantics=("parallel",),
                vmem_limit_bytes=int(vmem_budget_bytes)),
        )(x,
          params["wq"], params["bq"],
          params["wk"], params["bk"],
          params["wv"], params["bv"],
          params["wp"], params["bp"])

    try:
        return build(True)
    except Exception:
        # Fallback for jax versions without BlockSpec pipeline_mode / Buffered(1).
        return build(False)


def _reference(x, params, num_heads):
    """Pure-JAX reference mirroring the PyTorch forward (eval mode, raw params)."""
    B, N, E = x.shape
    D = E // num_heads

    def lin(t, w, b):
        return t @ w + b  # w already transposed to (E_in, E_out)

    q = lin(x, params["wq"], params["bq"]).reshape(B, N, num_heads, D).transpose(0, 2, 1, 3)
    k = lin(x, params["wk"], params["bk"]).reshape(B, N, num_heads, D).transpose(0, 2, 1, 3)
    v = lin(x, params["wv"], params["bv"]).reshape(B, N, num_heads, D).transpose(0, 2, 1, 3)
    energy = jnp.einsum("bhqd,bhkd->bhqk", q, k)
    att = jax.nn.softmax(energy / (E ** 0.5), axis=-1)
    out = jnp.einsum("bhqk,bhkd->bhqd", att, v)
    out = out.transpose(0, 2, 1, 3).reshape(B, N, E)
    return lin(out, params["wp"], params["bp"])


def make_params(key, emb_size):
    """Deterministic synthetic Linear params. w is (E_in, E_out), b is (1, E)."""
    keys = jax.random.split(key, 8)
    bound = 1.0 / (emb_size ** 0.5)

    def u(k, shape):
        return jax.random.uniform(k, shape, jnp.float32, -bound, bound)

    return {
        "wq": u(keys[0], (emb_size, emb_size)), "bq": u(keys[1], (1, emb_size)),
        "wk": u(keys[2], (emb_size, emb_size)), "bk": u(keys[3], (1, emb_size)),
        "wv": u(keys[4], (emb_size, emb_size)), "bv": u(keys[5], (1, emb_size)),
        "wp": u(keys[6], (emb_size, emb_size)), "bp": u(keys[7], (1, emb_size)),
    }


if __name__ == "__main__":
    key = jax.random.PRNGKey(0)

    # --- Test 1: module-sized shapes, exact and fast-math paths -------------
    B, N, E, H = 2, 8, 32, 4   # batch, seq, emb_size, num_heads
    kx, kp, kx2, kp2 = jax.random.split(key, 4)
    x = jax.random.normal(kx, (B, N, E), jnp.float32)
    params = make_params(kp, E)
    ref = _reference(x, params, H)

    # Exact (f32 MXU) path.
    prep = prepare_params(params, E, fast_math=False)
    out = multi_head_attention(x, prep, num_heads=H)
    out = jax.block_until_ready(out)
    assert out.shape == (B, N, E)
    assert jnp.allclose(out, ref, atol=1e-4, rtol=1e-4), "f32 kernel mismatch vs reference"

    # bf16-MXU fast-math path (bf16 weights in HBM, bf16 projections & attention,
    # f32 accumulation, approx reciprocal) — recommended on v6e/v7x.
    prep_fast = prepare_params(params, E, fast_math=True)
    out_fast = multi_head_attention(x, prep_fast, num_heads=H, fast_math=True)
    out_fast = jax.block_until_ready(out_fast)
    assert jnp.allclose(out_fast, ref, atol=2e-2, rtol=2e-2), "bf16 kernel mismatch vs reference"

    # --- Test 2: exercise the KV-tiled online-softmax path (n_kv > 1) -------
    B2, N2, E2, H2 = 2, 128, 64, 4
    x2 = jax.random.normal(kx2, (B2, N2, E2), jnp.float32)
    params2 = make_params(kp2, E2)
    ref2 = _reference(x2, params2, H2)
    prep2 = prepare_params(params2, E2, fast_math=False)
    out2 = multi_head_attention(x2, prep2, num_heads=H2, kv_tile=64)  # 2 KV tiles
    out2 = jax.block_until_ready(out2)
    assert jnp.allclose(out2, ref2, atol=1e-4, rtol=1e-4), "KV-tiled kernel mismatch vs reference"

    print("KERNEL_OK")
</pallas_src>

<mosaic_0001>
module attributes {stable_mosaic.version = 11 : i64} {
  func.func @mha_kernel(%arg0: i32, %arg1: memref<1x8x32xf32, #tpu.memory_space<vmem>>, %arg2: memref<32x32xf32, #tpu.memory_space<vmem>>, %arg3: memref<1x32xf32, #tpu.memory_space<vmem>>, %arg4: memref<32x32xf32, #tpu.memory_space<vmem>>, %arg5: memref<1x32xf32, #tpu.memory_space<vmem>>, %arg6: memref<32x32xf32, #tpu.memory_space<vmem>>, %arg7: memref<1x32xf32, #tpu.memory_space<vmem>>, %arg8: memref<32x32xf32, #tpu.memory_space<vmem>>, %arg9: memref<1x32xf32, #tpu.memory_space<vmem>>, %arg10: memref<1x8x32xf32, #tpu.memory_space<vmem>>) attributes {dimension_semantics = [#tpu.dimension_semantics<parallel>], iteration_bounds = array<i64: 2>, scalar_prefetch = 0 : i64, scratch_operands = 0 : i64, tpu.core_type = #tpu.core_type<tc>, window_params = [{transform_indices = @transform_0, window_bounds = array<i64: 1, 8, 32>}, {pipeline_mode = #tpu.pipeline_mode<synchronous>, transform_indices = @transform_1, window_bounds = array<i64: 32, 32>}, {pipeline_mode = #tpu.pipeline_mode<synchronous>, transform_indices = @transform_2, window_bounds = array<i64: 1, 32>}, {pipeline_mode = #tpu.pipeline_mode<synchronous>, transform_indices = @transform_3, window_bounds = array<i64: 32, 32>}, {pipeline_mode = #tpu.pipeline_mode<synchronous>, transform_indices = @transform_4, window_bounds = array<i64: 1, 32>}, {pipeline_mode = #tpu.pipeline_mode<synchronous>, transform_indices = @transform_5, window_bounds = array<i64: 32, 32>}, {pipeline_mode = #tpu.pipeline_mode<synchronous>, transform_indices = @transform_6, window_bounds = array<i64: 1, 32>}, {pipeline_mode = #tpu.pipeline_mode<synchronous>, transform_indices = @transform_7, window_bounds = array<i64: 32, 32>}, {pipeline_mode = #tpu.pipeline_mode<synchronous>, transform_indices = @transform_8, window_bounds = array<i64: 1, 32>}, {transform_indices = @transform_9, window_bounds = array<i64: 1, 8, 32>}]} {
    %c0 = arith.constant 0 : index
    %c0_0 = arith.constant 0 : index
    %c0_1 = arith.constant 0 : index
    %0 = vector.load %arg1[%c0, %c0_0, %c0_1] : memref<1x8x32xf32, #tpu.memory_space<vmem>>, vector<1x8x32xf32>
    %1 = vector.shape_cast %0 : vector<1x8x32xf32> to vector<8x32xf32>
    %c0_2 = arith.constant 0 : index
    %c0_3 = arith.constant 0 : index
    %2 = vector.load %arg3[%c0_2, %c0_3] : memref<1x32xf32, #tpu.memory_space<vmem>>, vector<1x32xf32>
    %c0_4 = arith.constant 0 : index
    %c0_5 = arith.constant 0 : index
    %3 = vector.load %arg5[%c0_4, %c0_5] : memref<1x32xf32, #tpu.memory_space<vmem>>, vector<1x32xf32>
    %c0_6 = arith.constant 0 : index
    %c0_7 = arith.constant 0 : index
    %4 = vector.load %arg7[%c0_6, %c0_7] : memref<1x32xf32, #tpu.memory_space<vmem>>, vector<1x32xf32>
    %c0_8 = arith.constant 0 : index
    %c0_9 = arith.constant 0 : index
    %5 = vector.load %arg9[%c0_8, %c0_9] : memref<1x32xf32, #tpu.memory_space<vmem>>, vector<1x32xf32>
    %c0_10 = arith.constant 0 : index
    %c0_11 = arith.constant 0 : index
    %6 = vector.load %arg2[%c0_10, %c0_11] : memref<32x32xf32, #tpu.memory_space<vmem>>, vector<32x32xf32>
    %cst = arith.constant dense<0.000000e+00> : vector<8x32xf32>
    %7 = tpu.matmul %1, %6, %cst {dimension_numbers = #tpu.dot_dimension_numbers<[1], [0], [0], [1], [0, 0, 1, 1], [], []>} : vector<8x32xf32>, vector<32x32xf32>, vector<8x32xf32> -> vector<8x32xf32>
    %8 = vector.broadcast %2 : vector<1x32xf32> to vector<8x32xf32>
    %9 = arith.addf %7, %8 : vector<8x32xf32>
    %c0_12 = arith.constant 0 : index
    %c0_13 = arith.constant 0 : index
    %10 = vector.load %arg4[%c0_12, %c0_13] : memref<32x32xf32, #tpu.memory_space<vmem>>, vector<32x32xf32>
    %cst_14 = arith.constant dense<0.000000e+00> : vector<8x32xf32>
    %11 = tpu.matmul %1, %10, %cst_14 {dimension_numbers = #tpu.dot_dimension_numbers<[1], [0], [0], [1], [0, 0, 1, 1], [], []>} : vector<8x32xf32>, vector<32x32xf32>, vector<8x32xf32> -> vector<8x32xf32>
    %12 = vector.broadcast %3 : vector<1x32xf32> to vector<8x32xf32>
    %13 = arith.addf %11, %12 : vector<8x32xf32>
    %c0_15 = arith.constant 0 : index
    %c0_16 = arith.constant 0 : index
    %14 = vector.load %arg6[%c0_15, %c0_16] : memref<32x32xf32, #tpu.memory_space<vmem>>, vector<32x32xf32>
    %cst_17 = arith.constant dense<0.000000e+00> : vector<8x32xf32>
    %15 = tpu.matmul %1, %14, %cst_17 {dimension_numbers = #tpu.dot_dimension_numbers<[1], [0], [0], [1], [0, 0, 1, 1], [], []>} : vector<8x32xf32>, vector<32x32xf32>, vector<8x32xf32> -> vector<8x32xf32>
    %16 = vector.broadcast %4 : vector<1x32xf32> to vector<8x32xf32>
    %17 = arith.addf %15, %16 : vector<8x32xf32>
    %18 = vector.shape_cast %9 : vector<8x32xf32> to vector<1x8x4x8xf32>
    %19 = tpu.transpose %18, [0, 2, 1, 3] : vector<1x8x4x8xf32> -> vector<1x4x8x8xf32>
    %20 = vector.shape_cast %19 : vector<1x4x8x8xf32> to vector<4x8x8xf32>
    %21 = vector.shape_cast %13 : vector<8x32xf32> to vector<1x8x4x8xf32>
    %22 = tpu.transpose %21, [0, 2, 1, 3] : vector<1x8x4x8xf32> -> vector<1x4x8x8xf32>
    %23 = vector.shape_cast %22 : vector<1x4x8x8xf32> to vector<4x8x8xf32>
    %24 = vector.shape_cast %17 : vector<8x32xf32> to vector<1x8x4x8xf32>
    %25 = tpu.transpose %24, [0, 2, 1, 3] : vector<1x8x4x8xf32> -> vector<1x4x8x8xf32>
    %26 = vector.shape_cast %25 : vector<1x4x8x8xf32> to vector<4x8x8xf32>
    "tpu.trace_start"() <{level = 10 : i32, message = "gqd,gkd->gqk"}> : () -> ()
    %cst_18 = arith.constant dense<0.000000e+00> : vector<4x8x8xf32>
    %27 = tpu.matmul %20, %23, %cst_18 {dimension_numbers = #tpu.dot_dimension_numbers<[2], [2], [1], [1], [0, 0, 0, 1, 1, 1], [0], [0]>} : vector<4x8x8xf32>, vector<4x8x8xf32>, vector<4x8x8xf32> -> vector<4x8x8xf32>
    "tpu.trace_stop"() : () -> ()
    %cst_19 = arith.constant dense<0xFF800000> : vector<4x8xf32>
    %28 = vector.multi_reduction <maximumf>, %27, %cst_19 [2] : vector<4x8x8xf32> to vector<4x8xf32>
    %29 = vector.shape_cast %28 : vector<4x8xf32> to vector<4x8x1xf32>
    %30 = vector.broadcast %29 : vector<4x8x1xf32> to vector<4x8x8xf32>
    %31 = arith.subf %27, %30 : vector<4x8x8xf32>
    %32 = math.exp %31 : vector<4x8x8xf32>
    %cst_20 = arith.constant dense<0.000000e+00> : vector<4x8xf32>
    %33 = vector.multi_reduction <add>, %32, %cst_20 [2] : vector<4x8x8xf32> to vector<4x8xf32>
    %34 = vector.shape_cast %33 : vector<4x8xf32> to vector<4x8x1xf32>
    "tpu.trace_start"() <{level = 10 : i32, message = "gqk,gkd->gqd"}> : () -> ()
    %cst_21 = arith.constant dense<0.000000e+00> : vector<4x8x8xf32>
    %35 = tpu.matmul %32, %26, %cst_21 {dimension_numbers = #tpu.dot_dimension_numbers<[2], [1], [1], [2], [0, 0, 0, 1, 1, 2], [0], [0]>} : vector<4x8x8xf32>, vector<4x8x8xf32>, vector<4x8x8xf32> -> vector<4x8x8xf32>
    "tpu.trace_stop"() : () -> ()
    %36 = tpu.reciprocal %34 : vector<4x8x1xf32> -> vector<4x8x1xf32>
    %37 = vector.broadcast %36 : vector<4x8x1xf32> to vector<4x8x8xf32>
    %38 = arith.mulf %35, %37 : vector<4x8x8xf32>
    %39 = vector.shape_cast %38 : vector<4x8x8xf32> to vector<1x4x8x8xf32>
    %40 = tpu.transpose %39, [0, 2, 1, 3] : vector<1x4x8x8xf32> -> vector<1x8x4x8xf32>
    %41 = vector.shape_cast %40 : vector<1x8x4x8xf32> to vector<8x32xf32>
    %c0_22 = arith.constant 0 : index
    %c0_23 = arith.constant 0 : index
    %42 = vector.load %arg8[%c0_22, %c0_23] : memref<32x32xf32, #tpu.memory_space<vmem>>, vector<32x32xf32>
    %cst_24 = arith.constant dense<0.000000e+00> : vector<8x32xf32>
    %43 = tpu.matmul %41, %42, %cst_24 {dimension_numbers = #tpu.dot_dimension_numbers<[1], [0], [0], [1], [0, 0, 1, 1], [], []>} : vector<8x32xf32>, vector<32x32xf32>, vector<8x32xf32> -> vector<8x32xf32>
    %44 = vector.broadcast %5 : vector<1x32xf32> to vector<8x32xf32>
    %45 = arith.addf %43, %44 : vector<8x32xf32>
    %46 = vector.shape_cast %45 : vector<8x32xf32> to vector<1x8x32xf32>
    %c0_25 = arith.constant 0 : index
    %c0_26 = arith.constant 0 : index
    %c0_27 = arith.constant 0 : index
    %47 = vector.load %arg10[%c0_25, %c0_26, %c0_27] : memref<1x8x32xf32, #tpu.memory_space<vmem>>, vector<1x8x32xf32>
    tpu.vector_store %arg10[%c0_25, %c0_26, %c0_27], %46 {strides = array<i32>} : memref<1x8x32xf32, #tpu.memory_space<vmem>>, vector<1x8x32xf32>,
    return
  }
  func.func @transform_0(%arg0: i32) -> (i32, i32, i32) {
    %c0_i32 = arith.constant 0 : i32
    %c0_i32_0 = arith.constant 0 : i32
    %c0_i32_1 = arith.constant 0 : i32
    return %arg0, %c0_i32, %c0_i32_0 : i32, i32, i32
  }
  func.func @transform_1(%arg0: i32) -> (i32, i32) {
    %c0_i32 = arith.constant 0 : i32
    %c0_i32_0 = arith.constant 0 : i32
    %c0_i32_1 = arith.constant 0 : i32
    return %c0_i32, %c0_i32_0 : i32, i32
  }
  func.func @transform_2(%arg0: i32) -> (i32, i32) {
    %c0_i32 = arith.constant 0 : i32
    %c0_i32_0 = arith.constant 0 : i32
    %c0_i32_1 = arith.constant 0 : i32
    return %c0_i32, %c0_i32_0 : i32, i32
  }
  func.func @transform_3(%arg0: i32) -> (i32, i32) {
    %c0_i32 = arith.constant 0 : i32
    %c0_i32_0 = arith.constant 0 : i32
    %c0_i32_1 = arith.constant 0 : i32
    return %c0_i32, %c0_i32_0 : i32, i32
  }
  func.func @transform_4(%arg0: i32) -> (i32, i32) {
    %c0_i32 = arith.constant 0 : i32
    %c0_i32_0 = arith.constant 0 : i32
    %c0_i32_1 = arith.constant 0 : i32
    return %c0_i32, %c0_i32_0 : i32, i32
  }
  func.func @transform_5(%arg0: i32) -> (i32, i32) {
    %c0_i32 = arith.constant 0 : i32
    %c0_i32_0 = arith.constant 0 : i32
    %c0_i32_1 = arith.constant 0 : i32
    return %c0_i32, %c0_i32_0 : i32, i32
  }
  func.func @transform_6(%arg0: i32) -> (i32, i32) {
    %c0_i32 = arith.constant 0 : i32
    %c0_i32_0 = arith.constant 0 : i32
    %c0_i32_1 = arith.constant 0 : i32
    return %c0_i32, %c0_i32_0 : i32, i32
  }
  func.func @transform_7(%arg0: i32) -> (i32, i32) {
    %c0_i32 = arith.constant 0 : i32
    %c0_i32_0 = arith.constant 0 : i32
    %c0_i32_1 = arith.constant 0 : i32
    return %c0_i32, %c0_i32_0 : i32, i32
  }
  func.func @transform_8(%arg0: i32) -> (i32, i32) {
    %c0_i32 = arith.constant 0 : i32
    %c0_i32_0 = arith.constant 0 : i32
    %c0_i32_1 = arith.constant 0 : i32
    return %c0_i32, %c0_i32_0 : i32, i32
  }
  func.func @transform_9(%arg0: i32) -> (i32, i32, i32) {
    %c0_i32 = arith.constant 0 : i32
    %c0_i32_0 = arith.constant 0 : i32
    %c0_i32_1 = arith.constant 0 : i32
    return %arg0, %c0_i32, %c0_i32_0 : i32, i32, i32
  }
}

module attributes {stable_mosaic.version = 11 : i64} {
  func.func @mha_kernel(%arg0: i32, %arg1: memref<1x8x32xf32, #tpu.memory_space<vmem>>, %arg2: memref<32x32xf32, #tpu.memory_space<vmem>>, %arg3: memref<1x32xf32, #tpu.memory_space<vmem>>, %arg4: memref<32x32xf32, #tpu.memory_space<vmem>>, %arg5: memref<1x32xf32, #tpu.memory_space<vmem>>, %arg6: memref<32x32xf32, #tpu.memory_space<vmem>>, %arg7: memref<1x32xf32, #tpu.memory_space<vmem>>, %arg8: memref<32x32xf32, #tpu.memory_space<vmem>>, %arg9: memref<1x32xf32, #tpu.memory_space<vmem>>, %arg10: memref<1x8x32xf32, #tpu.memory_space<vmem>>) attributes {dimension_semantics = [#tpu.dimension_semantics<parallel>], iteration_bounds = array<i64: 2>, scalar_prefetch = 0 : i64, scratch_operands = 0 : i64, tpu.core_type = #tpu.core_type<tc>, window_params = [{transform_indices = @transform_0, window_bounds = array<i64: 1, 8, 32>}, {pipeline_mode = #tpu.pipeline_mode<synchronous>, transform_indices = @transform_1, window_bounds = array<i64: 32, 32>}, {pipeline_mode = #tpu.pipeline_mode<synchronous>, transform_indices = @transform_2, window_bounds = array<i64: 1, 32>}, {pipeline_mode = #tpu.pipeline_mode<synchronous>, transform_indices = @transform_3, window_bounds = array<i64: 32, 32>}, {pipeline_mode = #tpu.pipeline_mode<synchronous>, transform_indices = @transform_4, window_bounds = array<i64: 1, 32>}, {pipeline_mode = #tpu.pipeline_mode<synchronous>, transform_indices = @transform_5, window_bounds = array<i64: 32, 32>}, {pipeline_mode = #tpu.pipeline_mode<synchronous>, transform_indices = @transform_6, window_bounds = array<i64: 1, 32>}, {pipeline_mode = #tpu.pipeline_mode<synchronous>, transform_indices = @transform_7, window_bounds = array<i64: 32, 32>}, {pipeline_mode = #tpu.pipeline_mode<synchronous>, transform_indices = @transform_8, window_bounds = array<i64: 1, 32>}, {transform_indices = @transform_9, window_bounds = array<i64: 1, 8, 32>}]} {
    %c0 = arith.constant 0 : index
    %c0_0 = arith.constant 0 : index
    %c0_1 = arith.constant 0 : index
    %0 = vector.load %arg1[%c0, %c0_0, %c0_1] : memref<1x8x32xf32, #tpu.memory_space<vmem>>, vector<1x8x32xf32>
    %1 = vector.shape_cast %0 : vector<1x8x32xf32> to vector<8x32xf32>
    %c0_2 = arith.constant 0 : index
    %c0_3 = arith.constant 0 : index
    %2 = vector.load %arg3[%c0_2, %c0_3] : memref<1x32xf32, #tpu.memory_space<vmem>>, vector<1x32xf32>
    %c0_4 = arith.constant 0 : index
    %c0_5 = arith.constant 0 : index
    %3 = vector.load %arg5[%c0_4, %c0_5] : memref<1x32xf32, #tpu.memory_space<vmem>>, vector<1x32xf32>
    %c0_6 = arith.constant 0 : index
    %c0_7 = arith.constant 0 : index
    %4 = vector.load %arg7[%c0_6, %c0_7] : memref<1x32xf32, #tpu.memory_space<vmem>>, vector<1x32xf32>
    %c0_8 = arith.constant 0 : index
    %c0_9 = arith.constant 0 : index
    %5 = vector.load %arg9[%c0_8, %c0_9] : memref<1x32xf32, #tpu.memory_space<vmem>>, vector<1x32xf32>
    %c0_10 = arith.constant 0 : index
    %c0_11 = arith.constant 0 : index
    %6 = vector.load %arg2[%c0_10, %c0_11] : memref<32x32xf32, #tpu.memory_space<vmem>>, vector<32x32xf32>
    %cst = arith.constant dense<0.000000e+00> : vector<8x32xf32>
    %7 = tpu.matmul %1, %6, %cst {dimension_numbers = #tpu.dot_dimension_numbers<[1], [0], [0], [1], [0, 0, 1, 1], [], []>} : vector<8x32xf32>, vector<32x32xf32>, vector<8x32xf32> -> vector<8x32xf32>
    %8 = vector.broadcast %2 : vector<1x32xf32> to vector<8x32xf32>
    %9 = arith.addf %7, %8 : vector<8x32xf32>
    %c0_12 = arith.constant 0 : index
    %c0_13 = arith.constant 0 : index
    %10 = vector.load %arg4[%c0_12, %c0_13] : memref<32x32xf32, #tpu.memory_space<vmem>>, vector<32x32xf32>
    %cst_14 = arith.constant dense<0.000000e+00> : vector<8x32xf32>
    %11 = tpu.matmul %1, %10, %cst_14 {dimension_numbers = #tpu.dot_dimension_numbers<[1], [0], [0], [1], [0, 0, 1, 1], [], []>} : vector<8x32xf32>, vector<32x32xf32>, vector<8x32xf32> -> vector<8x32xf32>
    %12 = vector.broadcast %3 : vector<1x32xf32> to vector<8x32xf32>
    %13 = arith.addf %11, %12 : vector<8x32xf32>
    %c0_15 = arith.constant 0 : index
    %c0_16 = arith.constant 0 : index
    %14 = vector.load %arg6[%c0_15, %c0_16] : memref<32x32xf32, #tpu.memory_space<vmem>>, vector<32x32xf32>
    %cst_17 = arith.constant dense<0.000000e+00> : vector<8x32xf32>
    %15 = tpu.matmul %1, %14, %cst_17 {dimension_numbers = #tpu.dot_dimension_numbers<[1], [0], [0], [1], [0, 0, 1, 1], [], []>} : vector<8x32xf32>, vector<32x32xf32>, vector<8x32xf32> -> vector<8x32xf32>
    %16 = vector.broadcast %4 : vector<1x32xf32> to vector<8x32xf32>
    %17 = arith.addf %15, %16 : vector<8x32xf32>
    %18 = vector.shape_cast %9 : vector<8x32xf32> to vector<1x8x4x8xf32>
    %19 = tpu.transpose %18, [0, 2, 1, 3] : vector<1x8x4x8xf32> -> vector<1x4x8x8xf32>
    %20 = vector.shape_cast %19 : vector<1x4x8x8xf32> to vector<4x8x8xf32>
    %21 = vector.shape_cast %13 : vector<8x32xf32> to vector<1x8x4x8xf32>
    %22 = tpu.transpose %21, [0, 2, 1, 3] : vector<1x8x4x8xf32> -> vector<1x4x8x8xf32>
    %23 = vector.shape_cast %22 : vector<1x4x8x8xf32> to vector<4x8x8xf32>
    %24 = vector.shape_cast %17 : vector<8x32xf32> to vector<1x8x4x8xf32>
    %25 = tpu.transpose %24, [0, 2, 1, 3] : vector<1x8x4x8xf32> -> vector<1x4x8x8xf32>
    %26 = vector.shape_cast %25 : vector<1x4x8x8xf32> to vector<4x8x8xf32>
    "tpu.trace_start"() <{level = 10 : i32, message = "gqd,gkd->gqk"}> : () -> ()
    %cst_18 = arith.constant dense<0.000000e+00> : vector<4x8x8xf32>
    %27 = tpu.matmul %20, %23, %cst_18 {dimension_numbers = #tpu.dot_dimension_numbers<[2], [2], [1], [1], [0, 0, 0, 1, 1, 1], [0], [0]>} : vector<4x8x8xf32>, vector<4x8x8xf32>, vector<4x8x8xf32> -> vector<4x8x8xf32>
    "tpu.trace_stop"() : () -> ()
    %cst_19 = arith.constant dense<0xFF800000> : vector<4x8xf32>
    %28 = vector.multi_reduction <maximumf>, %27, %cst_19 [2] : vector<4x8x8xf32> to vector<4x8xf32>
    %29 = vector.shape_cast %28 : vector<4x8xf32> to vector<4x8x1xf32>
    %30 = vector.broadcast %29 : vector<4x8x1xf32> to vector<4x8x8xf32>
    %31 = arith.subf %27, %30 : vector<4x8x8xf32>
    %32 = math.exp %31 : vector<4x8x8xf32>
    %cst_20 = arith.constant dense<0.000000e+00> : vector<4x8xf32>
    %33 = vector.multi_reduction <add>, %32, %cst_20 [2] : vector<4x8x8xf32> to vector<4x8xf32>
    %34 = vector.shape_cast %33 : vector<4x8xf32> to vector<4x8x1xf32>
    "tpu.trace_start"() <{level = 10 : i32, message = "gqk,gkd->gqd"}> : () -> ()
    %cst_21 = arith.constant dense<0.000000e+00> : vector<4x8x8xf32>
    %35 = tpu.matmul %32, %26, %cst_21 {dimension_numbers = #tpu.dot_dimension_numbers<[2], [1], [1], [2], [0, 0, 0, 1, 1, 2], [0], [0]>} : vector<4x8x8xf32>, vector<4x8x8xf32>, vector<4x8x8xf32> -> vector<4x8x8xf32>
    "tpu.trace_stop"() : () -> ()
    %36 = tpu.reciprocal %34 : vector<4x8x1xf32> -> vector<4x8x1xf32>
    %37 = vector.broadcast %36 : vector<4x8x1xf32> to vector<4x8x8xf32>
    %38 = arith.mulf %35, %37 : vector<4x8x8xf32>
    %39 = vector.shape_cast %38 : vector<4x8x8xf32> to vector<1x4x8x8xf32>
    %40 = tpu.transpose %39, [0, 2, 1, 3] : vector<1x4x8x8xf32> -> vector<1x8x4x8xf32>
    %41 = vector.shape_cast %40 : vector<1x8x4x8xf32> to vector<8x32xf32>
    %c0_22 = arith.constant 0 : index
    %c0_23 = arith.constant 0 : index
    %42 = vector.load %arg8[%c0_22, %c0_23] : memref<32x32xf32, #tpu.memory_space<vmem>>, vector<32x32xf32>
    %cst_24 = arith.constant dense<0.000000e+00> : vector<8x32xf32>
    %43 = tpu.matmul %41, %42, %cst_24 {dimension_numbers = #tpu.dot_dimension_numbers<[1], [0], [0], [1], [0, 0, 1, 1], [], []>} : vector<8x32xf32>, vector<32x32xf32>, vector<8x32xf32> -> vector<8x32xf32>
    %44 = vector.broadcast %5 : vector<1x32xf32> to vector<8x32xf32>
    %45 = arith.addf %43, %44 : vector<8x32xf32>
    %46 = vector.shape_cast %45 : vector<8x32xf32> to vector<1x8x32xf32>
    %c0_25 = arith.constant 0 : index
    %c0_26 = arith.constant 0 : index
    %c0_27 = arith.constant 0 : index
    %47 = vector.load %arg10[%c0_25, %c0_26, %c0_27] : memref<1x8x32xf32, #tpu.memory_space<vmem>>, vector<1x8x32xf32>
    tpu.vector_store %arg10[%c0_25, %c0_26, %c0_27], %46 {strides = array<i32>} : memref<1x8x32xf32, #tpu.memory_space<vmem>>, vector<1x8x32xf32>,
    return
  }
  func.func @transform_0(%arg0: i32) -> (i32, i32, i32) {
    %c0_i32 = arith.constant 0 : i32
    %c0_i32_0 = arith.constant 0 : i32
    %c0_i32_1 = arith.constant 0 : i32
    return %arg0, %c0_i32, %c0_i32_0 : i32, i32, i32
  }
  func.func @transform_1(%arg0: i32) -> (i32, i32) {
    %c0_i32 = arith.constant 0 : i32
    %c0_i32_0 = arith.constant 0 : i32
    %c0_i32_1 = arith.constant 0 : i32
    return %c0_i32, %c0_i32_0 : i32, i32
  }
  func.func @transform_2(%arg0: i32) -> (i32, i32) {
    %c0_i32 = arith.constant 0 : i32
    %c0_i32_0 = arith.constant 0 : i32
    %c0_i32_1 = arith.constant 0 : i32
    return %c0_i32, %c0_i32_0 : i32, i32
  }
  func.func @transform_3(%arg0: i32) -> (i32, i32) {
    %c0_i32 = arith.constant 0 : i32
    %c0_i32_0 = arith.constant 0 : i32
    %c0_i32_1 = arith.constant 0 : i32
    return %c0_i32, %c0_i32_0 : i32, i32
  }
  func.func @transform_4(%arg0: i32) -> (i32, i32) {
    %c0_i32 = arith.constant 0 : i32
    %c0_i32_0 = arith.constant 0 : i32
    %c0_i32_1 = arith.constant 0 : i32
    return %c0_i32, %c0_i32_0 : i32, i32
  }
  func.func @transform_5(%arg0: i32) -> (i32, i32) {
    %c0_i32 = arith.constant 0 : i32
    %c0_i32_0 = arith.constant 0 : i32
    %c0_i32_1 = arith.constant 0 : i32
    return %c0_i32, %c0_i32_0 : i32, i32
  }
  func.func @transform_6(%arg0: i32) -> (i32, i32) {
    %c0_i32 = arith.constant 0 : i32
    %c0_i32_0 = arith.constant 0 : i32
    %c0_i32_1 = arith.constant 0 : i32
    return %c0_i32, %c0_i32_0 : i32, i32
  }
  func.func @transform_7(%arg0: i32) -> (i32, i32) {
    %c0_i32 = arith.constant 0 : i32
    %c0_i32_0 = arith.constant 0 : i32
    %c0_i32_1 = arith.constant 0 : i32
    return %c0_i32, %c0_i32_0 : i32, i32
  }
  func.func @transform_8(%arg0: i32) -> (i32, i32) {
    %c0_i32 = arith.constant 0 : i32
    %c0_i32_0 = arith.constant 0 : i32
    %c0_i32_1 = arith.constant 0 : i32
    return %c0_i32, %c0_i32_0 : i32, i32
  }
  func.func @transform_9(%arg0: i32) -> (i32, i32, i32) {
    %c0_i32 = arith.constant 0 : i32
    %c0_i32_0 = arith.constant 0 : i32
    %c0_i32_1 = arith.constant 0 : i32
    return %arg0, %c0_i32, %c0_i32_0 : i32, i32, i32
  }
}

</mosaic_0001>

<bundles_post_ra>
// kernel: tpu_custom_call.1
= control target key start
LH: loop header
LB: loop body
LE: loop exit
PB: predicated region body
PF: predicated region fallthrough
CT: control target
= control target key end

     0   :  { %s2271_s0 = inlined_call_operand.hbm [shape: f32[2,8,32], index: 0, kind: input, shape index: {}]   ;;  %s2272_s1 = inlined_call_operand.hbm [shape: f32[32,32], index: 1, kind: input, shape index: {}]   ;;  %s2273_s2 = inlined_call_operand.vmem [shape: f32[1,32], index: 2, kind: input, shape index: {}]   ;;  %s2274_s3 = inlined_call_operand.hbm [shape: f32[32,32], index: 3, kind: input, shape index: {}]   ;;  %s2275_s4 = inlined_call_operand.vmem [shape: f32[1,32], index: 4, kind: input, shape index: {}]   ;;  %s2276_s5 = inlined_call_operand.hbm [shape: f32[32,32], index: 5, kind: input, shape index: {}]   ;;  %s2277_s6 = inlined_call_operand.vmem [shape: f32[1,32], index: 6, kind: input, shape index: {}]   ;;  %s2278_s7 = inlined_call_operand.hbm [shape: f32[32,32], index: 7, kind: input, shape index: {}]   ;;  %s2279_s8 = inlined_call_operand.vmem [shape: f32[1,32], index: 8, kind: input, shape index: {}]   ;;  %s2280_s9 = inlined_call_operand.hbm [shape: f32[2,8,32], index: 9, kind: output, shape index: {}]  }
   0x1   :  { %2281 = sst [smem:[#allocation16_spill]] %s2272_s1 }
   0x2   :  { %2282 = sst [smem:[#allocation17_spill]] %s2274_s3 }
   0x3   :  { %2283 = sst [smem:[#allocation18_spill]] %s2276_s5 }
   0x4   :  { %2284 = sst [smem:[#allocation19_spill]] %s2278_s7 }
   0x5   :  { %14 = vsyncpa [#allocation3], 0 }
   0x6   :  { %16 = vsyncpa [#allocation3 + $0x1], 0 }
   0x7   :  { %17 = vsyncpa [#allocation6], 0 }
   0x8   :  { %18 = vsyncpa [#allocation9], 0 }
   0x9   :  { %19 = vsyncpa [#allocation4], 0 }
   0xa   :  { %21 = vsyncpa [#allocation4 + $0x1], 0  ;;  %s1885_s30 = smov 0   ;;  %s1887_s10 = smov 0  }
   0xb   :  { %s1889_s11 = smov 0   ;;  %s1891_s12 = smov 0  }
   0xc LB: > { %s2285_s1 = sld [smem:[#allocation16_spill]]  ;;  %s1909_s16 = sadd.s32 4294967295, %s1819_s12   ;;  %s1819_s12 = sphi %s1891_s12, %s2302_s12   ;;  %s1815_s11 = sphi %s1889_s11, %s2301_s11   ;;  %s1811_s10 = sphi %s1887_s10, %s2300_s10   ;;  %s1807_s30 = sphi %s1885_s30, %s2299_s30  }
   0xd   : > { %p1443_p0 = scmp.ge.s32.totalorder %s1819_s12, 1  ;;  %p48_p1 = scmp.eq.s32.totalorder %s1909_s16, 0 }
   0xe   : > { %p252_p2 = scmp.lt.s32.totalorder %s1819_s12, 3  ;;  %s1821_s18 = smov [#allocation5]  }
   0xf   : > { %s265_s19 = sshll.u32 %s1821_s18, 4  ;;  %s2287_s5 = sld [smem:[#allocation18_spill]]  ;;  %s266_s19 = int_to_ptr.vmem [resolvable:$true] %s265_s19 }
  0x10   : > { %p1914_p3 = pnand %p1443_p0, %p252_p2  ;;  %s2289_s3 = sld [smem:[#allocation17_spill]] }
  0x11   : > { %s1822_s27 = smov [#allocation8]   ;;  %s1823_s29 = smov 128  }
  0x12   : > { %s263_s15 = sshll.u32 %s2285_s1, 4  ;;  %p1498_p4 = pneg %p1914_p3  ;;  %s264_s15 = int_to_ptr.hbm [resolvable:$true] %s263_s15 }
  0x13   : > { %s299_s28 = sshll.u32 %s1822_s27, 4  ;;  %s1824_s13 = smov 8   ;;  %s300_s28 = int_to_ptr.vmem [resolvable:$true] %s299_s28 }
  0x14   : > { %p1926_p6 = pnand %p1498_p4, %p48_p1  ;;  %s2290_s7 = sld [smem:[#allocation19_spill]] }
  0x15   : > { %s297_s22 = sshll.u32 %s2287_s5, 4  ;;  %s1825_s21 = smov [#allocation7]   ;;  %s298_s22 = int_to_ptr.hbm [resolvable:$true] %s297_s22 }
  0x16   : > { %s280_s26 = sshll.u32 %s2289_s3, 4  ;;  %s282_s24 = sshll.u32 %s1825_s21, 4  ;;  %s281_s26 = int_to_ptr.hbm [resolvable:$true] %s280_s26  ;;  %s283_s24 = int_to_ptr.vmem [resolvable:$true] %s282_s24 }
  0x17   : > { %1501 = dma.hbm_to_vmem [thread:$0]  (!%p1926_p6), %s264_s15, 512, %s266_s19, [#allocation6], %s1823_s29, %s1823_s29, %s1824_s13  }
  0x18   : > { %1507 = dma.hbm_to_vmem [thread:$0]  (!%p1926_p6), %s298_s22, 512, %s300_s28, [#allocation9], %s1823_s29, %s1823_s29, %s1824_s13  }
  0x19   : > { %1504 = dma.hbm_to_vmem [thread:$0]  (!%p1926_p6), %s281_s26, 512, %s283_s24, [#allocation6], %s1823_s29, %s1823_s29, %s1824_s13  }
  0x1a   : > { %s314_s20 = sshll.u32 %s2290_s7, 4  ;;  %s1826_s15 = smov [#allocation10]   ;;  %s315_s20 = int_to_ptr.hbm [resolvable:$true] %s314_s20 }
  0x1b   : > { %s316_s19 = sshll.u32 %s1826_s15, 4  ;;  %s1442_s22 = sadd.s32 4294967294, %s1819_s12   ;;  %s317_s19 = int_to_ptr.vmem [resolvable:$true] %s316_s19 }
  0x1c   : > { %1510 = dma.hbm_to_vmem [thread:$0]  (!%p1926_p6), %s315_s20, 512, %s317_s19, [#allocation9], %s1823_s29, %s1823_s29, %s1824_s13  }
  0x1d   : > { %s1946_s25 = sadd.s32 1, %s1819_s12   ;;  %s34_s28 = sadd.s32 1, %s1815_s11 }
  0x1e   : > { %s31_s27 = ssub.s32 %s1819_s12, %s1946_s25  ;;  %p41_p8 = scmp.ne.s32.totalorder %s1815_s11, %s1811_s10 }
  0x1f   : > { %p32_p7 = scmp.eq.s32.totalorder %s31_s27, 0  ;;  %p42_p9 = scmp.eq.s32.totalorder %s1819_s12, 0 }
  0x20   : > { %p47_p10 = scmp.ne.s32.totalorder %s1811_s10, %s1807_s30  ;;  %p239_p13 = scmp.eq.s32.totalorder %s1909_s16, 1 }
  0x21   : > { %s1957_s26 = scalar_select %p32_p7, %s1815_s11, %s34_s28  }
  0x22   : > { %p1959_p11 = por %p42_p9, %p41_p8  ;;  %p1965_p12 = por %p48_p1, %p47_p10 }
  0x23   : > { %p245_p0 = scmp.eq.s32.totalorder %s1442_s22, 1  ;;  %p1523_p2 = scmp.lt.s32.totalorder %s1819_s12, 2 }
  0x24   : > { %s333_s29 = sand.u32 1, %s1815_s11   ;;  %p1972_p4 = por %p239_p13, %p41_p8 }
  0x25   : > { %p1976_p6 = por %p245_p0, %p47_p10  ;;  %s1449_s20 = sshll.u32 %s333_s29, 3 }
  0x26   : > { %s1450_s21 = sshll.u32 %s1819_s12, 3  ;;  %s337_s27 = scalar_lea.vmem [#allocation2], %s1449_s20 }
  0x27   : > { %s341_s19 = scalar_lea.hbm %s2271_s0, %s1450_s21  ;;  %s345_s28 = sshll.u32 %s337_s27, 4  ;;  %s346_s28 = int_to_ptr.vmem [resolvable:$true] %s345_s28 }
  0x28   : > { %s343_s1 = sshll.u32 %s341_s19, 4  ;;  %p1986_p7 = pnand %p1523_p2, %p1959_p11  ;;  %s344_s1 = int_to_ptr.hbm [resolvable:$true] %s343_s1 }
  0x29   : > { %s334_s3 = scalar_lea.sflag [#allocation3], %s333_s29  ;;  %s1715_s5 = sshra.s32 %s344_s1, 4  ;;  %s1716_s5 = int_to_ptr.hbm [resolvable:$true] %s1715_s5 }
  0x2a   : > { %s1717_s7 = scalar_lea.hbm %s1716_s5, 8  ;;  %p1719_p9 = pneg %p1986_p7 }
  0x2b   : > { %p1718_p8 = scmp.ne.s32.totalorder %s1716_s5, %s1717_s7  ;;  %s1722_s24 = scalar_lea.hbm %s2271_s0, 16 }
  0x2c   : > { %p1723_p11 = scmp.lt.s32.totalorder %s1716_s5, %s2271_s0  ;;  %p1724_p0 = scmp.lt.s32.totalorder %s1722_s24, %s1717_s7 }
  0x2d   : > { %p1720_p10 = pnand %p1719_p9, %p1718_p8 }
  0x2e   : > { %p1725_p2 = por %p1724_p0, %p1723_p11 }
  0x2f   : > { %p1721_p13 = pneg %p1720_p10 }
  0x31   : > { %p1726_p5 = pnand %p1725_p2, %p1721_p13 }
  0x33   : > { %1729 = shalt.err (!%p1726_p5)
}
  0x34   : > { %1514 = dma.hbm_to_vmem [thread:$0]  (!%p1986_p7), %s344_s1, 128, %s346_s28, %s334_s3  }
  0x35   : > { %354 = sbr.rel (%p1914_p3) target bundleno = 1035 (0x40b), region = 56  ;;  %s2003_s29 = sand.u32 (!%p1914_p3), 1, %s1811_s10  }
  0x36   : > { %s1452_s19 = sshll.u32 (!%p1914_p3), %s2003_s29, 3  ;;  %s357_s27 = scalar_lea.sflag (!%p1914_p3), [#allocation3], %s2003_s29 }
  0x37   : > { %s360_s5 = scalar_lea.vmem (!%p1914_p3), [#allocation2], %s1452_s19 }
  0x3a   : > { %1790 = dma.done.wait (%p1965_p12), %s357_s27, 128  }
  0x3b   : > { %1792 = vsyncadd (%p1965_p12), %s357_s27, 4294967168 }
  0x3c   : > { %1794 = dma.done.wait (%p48_p1), [#allocation6], 1024  }
  0x3d   : > { %1796 = vsyncadd (%p48_p1), [#allocation6], 4294966272 }
  0x3e   : > { %1798 = dma.done.wait (%p48_p1), [#allocation9], 1024  }
  0x3f   : > { %1800 = vsyncadd (%p48_p1), [#allocation9], 4294966272  ;;  %v424_v0 = vld [vmem:[#allocation5 + $0x18] sm:$0xff]  ;;  %v423_v2 = vld [vmem:[#allocation5 + $0x10] sm:$0xff]  ;;  %vm428_vm0 = vcmask 261120   ;;  %s1827_s23 = smov 104  }
  0x40   : > { %v455_v1 = vld [vmem:[#allocation7 + $0x18] sm:$0xff]  ;;  %444 = vmatpush.msra.mxu0 %v424_v0  ;;  %v454_v3 = vld [vmem:[#allocation7 + $0x10] sm:$0xff]  ;;  %v422_v4 = vld [vmem:[#allocation5 + $0x8] sm:$0xff]  ;;  %s1828_s28 = smov 120   ;;  %s1829_s22 = smov 112   ;;  %vm517_vm1 = vcmask 1047556  }
  0x41   : > { %471 = vmatpush.msra.mxu1 %v455_v1  ;;  %v453_v5 = vld [vmem:[#allocation7 + $0x8] sm:$0xff]  ;;  %v421_v6 = vld [vmem:[#allocation5] sm:$0xff]  ;;  %v482_v7 = vld [vmem:[#allocation8 + $0x18] sm:$0xff]  ;;  %v1830_v23 = vmov 1983009808   ;;  %vm867_vm2 = vcmask 64512  }
  0x42   : > { %445 = vmatpush.msra.mxu0 %v423_v2  ;;  %v481_v8 = vld [vmem:[#allocation8 + $0x10] sm:$0xff]  ;;  %v452_v9 = vld [vmem:[#allocation7] sm:$0xff]  ;;  %498 = vmatpush.msra.mxu2 %v482_v7  ;;  %v480_v11 = vld [vmem:[#allocation8 + $0x8] sm:$0xff]  ;;  %v522_v24 = vunpack.c.l.s4 %v1830_v23  ;;  %v1831_v36 = vmov 1934713408   ;;  %s1832_s24 = smov 24  }
  0x43   : > { %472 = vmatpush.msra.mxu1 %v454_v3  ;;  %v416_v10 = vld [vmem:[%s360_s5] sm:$0xff]  ;;  %v479_v12 = vld [vmem:[#allocation8] sm:$0xff]  ;;  %v546_v37 = vunpack.c.l.s4 %v1831_v36  ;;  %s1833_s15 = smov 16   ;;  %s1834_s14 = smov 8  }
  0x44   : > { %446 = vmatpush.msra.mxu0 %v422_v4  ;;  %499 = vmatpush.msra.mxu2 %v481_v8  ;;  %v1575_v13 = vld [vmem:[%s2273_s2] ss:$0 sm:$0xff]  ;;  %v2039_v32 = vunpack.c.0.s8 %v522_v24  ;;  %s1475_s27 = sshll.u32 %s1909_s16, 3  ;;  %s1319_s16 = scalar_lea.sflag [#allocation4], %s2003_s29 }
  0x45   : > { %473 = vmatpush.msra.mxu1 %v453_v5  ;;  %v1576_v14 = vld [vmem:[%s2275_s4] ss:$0 sm:$0xff]  ;;  %v2048_v45 = vunpack.c.0.s8 %v546_v37  ;;  %s1329_s3 = scalar_lea.hbm %s2280_s9, %s1475_s27 }
  0x46   : > { %447 = vmatpush.msra.mxu0 %v421_v6  ;;  %500 = vmatpush.msra.mxu2 %v480_v11  ;;  %v1577_v19 = vld [vmem:[%s2277_s6] ss:$0 sm:$0xff] }
  0x47   : > { %474 = vmatpush.msra.mxu1 %v452_v9  ;;  %1458 = vmatmul.msk.f32.vlgmr.msra.gmra.mxu0 %vm428_vm0, %v416_v10 }
  0x48   : > { %1459 = vmatmul.msk.f32.vlgmr.msra.gmra.mxu1 %vm428_vm0, %v416_v10  ;;  %501 = vmatpush.msra.mxu2 %v479_v12 }
  0x49   : > { %1460 = vmatmul.msk.f32.vlgmr.msra.gmra.mxu2 %vm428_vm0, %v416_v10 }
  0xc4   : > { %v449_v15 = vpop.f32.mrf.mxu0 }
  0xc5   : > { %v476_v16 = vpop.f32.mrf.mxu1  ;;  %v450_v17 = vadd.f32 %v1575_v13, %v449_v15 }
  0xc6   : > { %v477_v18 = vadd.f32 %v1576_v14, %v476_v16 }
  0xc7   : > { %510 = vrot.lane.b32.xlu2 %v450_v17, %s1829_s22  ;;  %v519_v30 = vrot.slane %v450_v17, 4 }
  0xc8   : > { %634 = vrot.lane.b32.xlu1 %v477_v18, %s1827_s23  ;;  %628 = vrot.lane.b32.xlu0 %v477_v18, %s1828_s28  ;;  %v639_v43 = vrot.slane %v477_v18, 4 }
  0xcc   : > { %v503_v20 = vpop.f32.mrf.mxu2 }
  0xcd   : > { %v2033_v21 = vadd.f32 %v1577_v19, %v503_v20 }
  0xcf   : > { %513 = vrot.lane.b32.xlu2 %v450_v17, %s1827_s23 }
  0xd0   : > { %631 = vrot.lane.b32.xlu0 %v477_v18, %s1829_s22  ;;  %507 = vrot.lane.b32.xlu1 %v450_v17, %s1828_s28 }
  0xd7   : > { %754 = vrot.lane.b32.xlu2 %v2033_v21, %s1827_s23  ;;  %s415_s23 = scalar_lea.vmem [#allocation11], %s1452_s19  ;;  %s1765_s19 = scalar_lea.hbm %s2280_s9, 16 }
  0xd8   : > { %748 = vrot.lane.b32.xlu0 %v2033_v21, %s1828_s28  ;;  %751 = vrot.lane.b32.xlu1 %v2033_v21, %s1829_s22  ;;  %s1331_s28 = sshll.u32 %s415_s23, 4  ;;  %s1333_s22 = sshll.u32 %s1329_s3, 4  ;;  %s1332_s28 = int_to_ptr.vmem [resolvable:$true] %s1331_s28  ;;  %s1334_s22 = int_to_ptr.hbm [resolvable:$true] %s1333_s22 }
  0xd9   : > { %s1759_s20 = sshra.s32 %s1334_s22, 4  ;;  %s1760_s20 = int_to_ptr.hbm [resolvable:$true] %s1759_s20 }
  0xda   : > { %s1761_s21 = scalar_lea.hbm %s1760_s20, 8  ;;  %p1766_p12 = scmp.lt.s32.totalorder %s1760_s20, %s2280_s9 }
  0xdb   : > { %p1762_p1 = scmp.ne.s32.totalorder %s1760_s20, %s1761_s21  ;;  %p1767_p7 = scmp.lt.s32.totalorder %s1765_s19, %s1761_s21 }
  0xdd   : > { %p1763_p3 = pnand %p1762_p1, %p1972_p4  ;;  %p1768_p8 = por %p1767_p7, %p1766_p12 }
  0xdf   : > { %p1764_p5 = pneg %p1763_p3 }
  0xe1   : > { %p1769_p9 = pnand %p1768_p8, %p1764_p5 }
 0x121   : > { %v511_v22 = vpop.permute.xlu2 %510 }
 0x122   : > { %v516_v25 = vrot.slane %v511_v22, 4  ;;  %v520_v38 = vsel %vm517_vm1, %v511_v22, %v519_v30 }
 0x123   : > { %v528_v44 = vperm.slane %v520_v38, %v2039_v32 }
 0x124   : > { %v518_v33 = vsel %vm517_vm1, %v516_v25, %v450_v17 }
 0x125   : > { %v524_v40 = vperm.slane %v518_v33, %v2039_v32  ;;  %v555_v63 = vrot.slane %v528_v44, 4 }
 0x127   : > { %v543_v55 = vrot.slane %v524_v40, 4 }
 0x129   : > { %v514_v34 = vpop.permute.xlu2 %513 }
 0x12a   : > { %v529_v41 = vrot.slane %v514_v34, 4 }
 0x13a   : > { %v635_v26 = vpop.permute.xlu1 %634  ;;  %v629_v27 = vpop.permute.xlu0 %628 }
 0x13b   : > { %v649_v28 = vrot.slane %v635_v26, 4  ;;  %v651_v29 = vrot.slane %v629_v27, 4 }
 0x13d   : > { %v652_v31 = vsel %vm517_vm1, %v635_v26, %v651_v29  ;;  %v650_v35 = vsel %vm517_vm1, %v649_v28, %v629_v27 }
 0x13e   : > { %v660_v39 = vperm.slane %v652_v31, %v2039_v32  ;;  %v656_v42 = vperm.slane %v650_v35, %v2039_v32 }
 0x140   : > { %v673_v52 = vrot.slane %v660_v39, 4  ;;  %v661_v56 = vrot.slane %v656_v42, 4 }
 0x142   : > { %v632_v46 = vpop.permute.xlu0 %631  ;;  %v508_v47 = vpop.permute.xlu1 %507 }
 0x143   : > { %v637_v48 = vrot.slane %v632_v46, 4  ;;  %v640_v49 = vsel %vm517_vm1, %v632_v46, %v639_v43  ;;  %v530_v50 = vsel %vm517_vm1, %v529_v41, %v508_v47  ;;  %v531_v51 = vrot.slane %v508_v47, 4 }
 0x144   : > { %v648_v53 = vperm.slane %v640_v49, %v2039_v32  ;;  %v536_v54 = vperm.slane %v530_v50, %v2039_v32 }
 0x145   : > { %v638_v57 = vsel %vm517_vm1, %v637_v48, %v477_v18  ;;  %v532_v58 = vsel %vm517_vm1, %v514_v34, %v531_v51 }
 0x146   : > { %v644_v59 = vperm.slane %v638_v57, %v2039_v32  ;;  %v674_v60 = vsel %vm517_vm1, %v673_v52, %v648_v53  ;;  %v675_v61 = vrot.slane %v648_v53, 4  ;;  %v540_v62 = vperm.slane %v532_v58, %v2039_v32 }
 0x147   : > { %v680_v0 = vperm.slane %v674_v60, %v2048_v45  ;;  %v541_v1 = vrot.slane %v536_v54, 4  ;;  %v544_v2 = vsel %vm517_vm1, %v536_v54, %v543_v55 }
 0x148   : > { %v662_v3 = vsel %vm517_vm1, %v661_v56, %v644_v59  ;;  %v663_v4 = vrot.slane %v644_v59, 4  ;;  %v676_v5 = vsel %vm517_vm1, %v660_v39, %v675_v61  ;;  %v552_v6 = vperm.slane %v544_v2, %v2048_v45 }
 0x149   : > { %v668_v7 = vperm.slane %v662_v3, %v2048_v45  ;;  %v684_v8 = vperm.slane %v676_v5, %v2048_v45  ;;  %v689_v9 = vrot.slane %v680_v0, 4  ;;  %v542_v10 = vsel %vm517_vm1, %v541_v1, %v524_v40 }
 0x14a   : > { %v664_v11 = vsel %vm517_vm1, %v656_v42, %v663_v4  ;;  %v548_v12 = vperm.slane %v542_v10, %v2048_v45  ;;  %v553_v13 = vrot.slane %v540_v62, 4  ;;  %v556_v14 = vsel %vm517_vm1, %v540_v62, %v555_v63 }
 0x14b   : > { %v672_v15 = vperm.slane %v664_v11, %v2048_v45  ;;  %v685_v16 = vrot.slane %v668_v7, 4  ;;  %v690_v17 = vsel %vm517_vm1, 0.0, %v689_v9  ;;  %v691_v18 = vrot.slane %v684_v8, 4 }
 0x14c   : > { %v554_v19 = vsel %vm517_vm1, %v553_v13, %v528_v44  ;;  %v564_v20 = vperm.slane %v556_v14, %v2048_v45  ;;  %v565_v22 = vrot.slane %v548_v12, 4  ;;  %v567_v23 = vrot.slane %v552_v6, 4 }
 0x14d   : > { %v687_v24 = vrot.slane %v672_v15, 4  ;;  %v692_v25 = vsel %vm517_vm1, 0.0, %v691_v18  ;;  %v704_v26 = vsel %vm517_vm1, %v691_v18, %v680_v0  ;;  %v560_v27 = vperm.slane %v554_v19, %v2048_v45 }
 0x14e   : > { %v708_v28 = vperm.slane %v704_v26, %v2039_v32  ;;  %v709_v29 = vrot.slane %v692_v25, 4  ;;  %v566_v30 = vsel %vm517_vm1, 0.0, %v565_v22  ;;  %v568_v31 = vsel %vm517_vm1, 0.0, %v567_v23 }
 0x14f   : > { %v688_v33 = vsel %vm517_vm1, 0.0, %v687_v24  ;;  %v569_v34 = vrot.slane %v560_v27, 4  ;;  %v571_v35 = vrot.slane %v564_v20, 4  ;;  %v573_v36 = vsel %vm517_vm1, %v567_v23, %v548_v12 }
 0x150   : > { %v710_v37 = vsel %vm517_vm1, %v709_v29, %v690_v17  ;;  %v577_v38 = vperm.slane %v573_v36, %v2039_v32  ;;  %v578_v39 = vrot.slane %v568_v31, 4  ;;  %v686_v40 = vsel %vm517_vm1, 0.0, %v685_v16 }
 0x151   : > { %v572_v41 = vsel %vm517_vm1, 0.0, %v571_v35  ;;  %v584_v42 = vsel %vm517_vm1, %v571_v35, %v560_v27  ;;  %v693_v43 = vsel %vm517_vm1, %v687_v24, %v668_v7  ;;  %v698_v44 = vrot.slane %v688_v33, 4  ;;  %v755_v35 = vpop.permute.xlu2 %754 }
 0x152   : > { %v589_v46 = vrot.slane %v572_v41, 4  ;;  %v697_v47 = vperm.slane %v693_v43, %v2039_v32  ;;  %v714_v48 = vperm.slane %v710_v37, %v2039_v32  ;;  %v729_v49 = vrot.slane %v708_v28, 4 }
 0x153   : > { %v699_v50 = vsel %vm517_vm1, %v698_v44, %v686_v40  ;;  %v570_v51 = vsel %vm517_vm1, 0.0, %v569_v34  ;;  %v579_v52 = vsel %vm517_vm1, %v578_v39, %v566_v30  ;;  %v588_v53 = vperm.slane %v584_v42, %v2039_v32  ;;  %v752_v39 = vpop.permute.xlu1 %751 }
 0x154   : > { %v703_v54 = vperm.slane %v699_v50, %v2039_v32  ;;  %v717_v55 = vrot.slane %v697_v47, 4  ;;  %v730_v56 = vsel %vm517_vm1, %v714_v48, %v729_v49  ;;  %v727_v57 = vrot.slane %v714_v48, 4 }
 0x155   : > { %v738_v58 = vperm.slane %v730_v56, %v2048_v45  ;;  %v583_v59 = vperm.slane %v579_v52, %v2039_v32  ;;  %v590_v60 = vsel %vm517_vm1, %v589_v46, %v570_v51  ;;  %v597_v61 = vrot.slane %v577_v38, 4 }
 0x156   : > { %v718_v62 = vsel %vm517_vm1, %v703_v54, %v717_v55  ;;  %v715_v63 = vrot.slane %v703_v54, 4  ;;  %v728_v0 = vsel %vm517_vm1, %v727_v57, %v708_v28  ;;  %v594_v1 = vperm.slane %v590_v60, %v2039_v32 }
 0x157   : > { %v726_v2 = vperm.slane %v718_v62, %v2048_v45  ;;  %v743_v3 = vrot.slane %v738_v58, 4  ;;  %v734_v4 = vperm.slane %v728_v0, %v2048_v45  ;;  %v598_v5 = vsel %vm517_vm1, %v583_v59, %v597_v61 }
 0x158   : > { %v716_v6 = vsel %vm517_vm1, %v715_v63, %v697_v47  ;;  %v606_v7 = vperm.slane %v598_v5, %v2048_v45  ;;  %v609_v8 = vrot.slane %v588_v53, 4  ;;  %v595_v9 = vrot.slane %v583_v59, 4 }
 0x159   : > { %v744_v10 = vsel %vm517_vm1, %v743_v3, %v726_v2  ;;  %v722_v11 = vperm.slane %v716_v6, %v2048_v45  ;;  %v739_v12 = vrot.slane %v734_v4, 4  ;;  %v745_v13 = vrot.slane %v726_v2, 4 }
 0x15a   : > { %1465 = vmatpush.xpose.msk.msrb.mxu0 %vm867_vm2, %v744_v10  ;;  %v610_v14 = vsel %vm517_vm1, %v594_v1, %v609_v8  ;;  %v607_v15 = vrot.slane %v594_v1, 4  ;;  %v625_v16 = vrot.slane %v606_v7, 4  ;;  %v596_v22 = vsel %vm517_vm1, %v595_v9, %v577_v38  ;;  %v749_v38 = vpop.permute.xlu0 %748 }
 0x15b   : > { %v740_v17 = vsel %vm517_vm1, %v739_v12, %v722_v11  ;;  %v746_v18 = vsel %vm517_vm1, %v738_v58, %v745_v13  ;;  %v618_v19 = vperm.slane %v610_v14, %v2048_v45  ;;  %v741_v20 = vrot.slane %v722_v11, 4 }
 0x15c   : > { %1461 = vmatpush.xpose.msk.msra.mxu3 %vm867_vm2, %v740_v17  ;;  %1467 = vmatpush.xpose.msk.msrb.mxu1 %vm867_vm2, %v746_v18  ;;  %v608_v23 = vsel %vm517_vm1, %v607_v15, %v588_v53  ;;  %v602_v29 = vperm.slane %v596_v22, %v2048_v45  ;;  %v759_v36 = vrot.slane %v2033_v21, 4  ;;  %v769_v37 = vrot.slane %v755_v35, 4 }
 0x15d   : > { %v623_v24 = vrot.slane %v618_v19, 4  ;;  %v742_v25 = vsel %vm517_vm1, %v734_v4, %v741_v20  ;;  %v614_v26 = vperm.slane %v608_v23, %v2048_v45  ;;  %v626_v27 = vsel %vm517_vm1, %v618_v19, %v625_v16 }
 0x15e   : > { %v621_v33 = vrot.slane %v602_v29, 4  ;;  %v771_v40 = vrot.slane %v749_v38, 4  ;;  %v757_v41 = vrot.slane %v752_v39, 4  ;;  %v760_v42 = vsel %vm517_vm1, %v752_v39, %v759_v36 }
 0x15f   : > { %v624_v28 = vsel %vm517_vm1, %v623_v24, %v606_v7  ;;  %v619_v30 = vrot.slane %v614_v26, 4  ;;  %1468 = vmatmul.msk.f32.vlgmr.msrb.gmra.mxu1 %vm867_vm2, %v626_v27  ;;  %v770_v43 = vsel %vm517_vm1, %v769_v37, %v749_v38  ;;  %v768_v44 = vperm.slane %v760_v42, %v2039_v32 }
 0x160   : > { %1463 = vmatpush.xpose.msk.msrb.mxu3 %vm867_vm2, %v742_v25  ;;  %1466 = vmatmul.msk.f32.vlgmr.msrb.gmra.mxu0 %vm867_vm2, %v624_v28  ;;  %v622_v34 = vsel %vm517_vm1, %v614_v26, %v621_v33  ;;  %v776_v46 = vperm.slane %v770_v43, %v2039_v32  ;;  %v758_v47 = vsel %vm517_vm1, %v757_v41, %v2033_v21 }
 0x161   : > { %v620_v31 = vsel %vm517_vm1, %v619_v30, %v602_v29  ;;  %v772_v48 = vsel %vm517_vm1, %v755_v35, %v771_v40  ;;  %v764_v49 = vperm.slane %v758_v47, %v2039_v32  ;;  %v795_v50 = vrot.slane %v768_v44, 4 }
 0x162   : > { %1462 = vmatmul.msk.f32.vlgmr.msra.gmra.mxu3 %vm867_vm2, %v620_v31  ;;  %v780_v51 = vperm.slane %v772_v48, %v2039_v32  ;;  %v781_v52 = vrot.slane %v776_v46, 4 }
 0x163   : > { %v783_v53 = vrot.slane %v764_v49, 4 }
 0x164   : > { %v782_v54 = vsel %vm517_vm1, %v781_v52, %v764_v49  ;;  %v793_v55 = vrot.slane %v780_v51, 4  ;;  %v796_v56 = vsel %vm517_vm1, %v780_v51, %v795_v50 }
 0x165   : > { %v788_v57 = vperm.slane %v782_v54, %v2048_v45  ;;  %v804_v58 = vperm.slane %v796_v56, %v2048_v45  ;;  %v784_v21 = vsel %vm517_vm1, %v776_v46, %v783_v53 }
 0x166   : > { %v794_v59 = vsel %vm517_vm1, %v793_v55, %v768_v44  ;;  %v792_v60 = vperm.slane %v784_v21, %v2048_v45 }
 0x167   : > { %v800_v61 = vperm.slane %v794_v59, %v2048_v45  ;;  %v805_v62 = vrot.slane %v788_v57, 4  ;;  %v811_v63 = vrot.slane %v804_v58, 4 }
 0x168   : > { %v807_v0 = vrot.slane %v792_v60, 4 }
 0x169   : > { %v809_v1 = vrot.slane %v800_v61, 4  ;;  %v812_v2 = vsel %vm517_vm1, 0.0, %v811_v63  ;;  %v824_v3 = vsel %vm517_vm1, %v811_v63, %v800_v61  ;;  %v806_v8 = vsel %vm517_vm1, 0.0, %v805_v62 }
 0x16a   : > { %1464 = vmatmul.msk.f32.vlgmr.msrb.gmra.mxu3 %vm867_vm2, %v622_v34  ;;  %v829_v4 = vrot.slane %v812_v2, 4  ;;  %v828_v5 = vperm.slane %v824_v3, %v2039_v32  ;;  %v808_v6 = vsel %vm517_vm1, 0.0, %v807_v0  ;;  %v813_v9 = vsel %vm517_vm1, %v807_v0, %v788_v57 }
 0x16b   : > { %v810_v7 = vsel %vm517_vm1, 0.0, %v809_v1  ;;  %v818_v10 = vrot.slane %v808_v6, 4  ;;  %v817_v11 = vperm.slane %v813_v9, %v2039_v32 }
 0x16c   : > { %v830_v12 = vsel %vm517_vm1, %v829_v4, %v810_v7  ;;  %v849_v13 = vrot.slane %v828_v5, 4 }
 0x16d   : > { %v834_v14 = vperm.slane %v830_v12, %v2039_v32  ;;  %v819_v15 = vsel %vm517_vm1, %v818_v10, %v806_v8  ;;  %v837_v16 = vrot.slane %v817_v11, 4 }
 0x16e   : > { %v823_v17 = vperm.slane %v819_v15, %v2039_v32 }
 0x16f   : > { %v847_v18 = vrot.slane %v834_v14, 4  ;;  %v850_v19 = vsel %vm517_vm1, %v834_v14, %v849_v13 }
 0x170   : > { %v858_v20 = vperm.slane %v850_v19, %v2048_v45  ;;  %v835_v22 = vrot.slane %v823_v17, 4  ;;  %v838_v24 = vsel %vm517_vm1, %v823_v17, %v837_v16 }
 0x171   : > { %v848_v23 = vsel %vm517_vm1, %v847_v18, %v828_v5  ;;  %v846_v26 = vperm.slane %v838_v24, %v2048_v45 }
 0x172   : > { %v854_v25 = vperm.slane %v848_v23, %v2048_v45  ;;  %v863_v27 = vrot.slane %v858_v20, 4  ;;  %v836_v28 = vsel %vm517_vm1, %v835_v22, %v817_v11 }
 0x173   : > { %v842_v29 = vperm.slane %v836_v28, %v2048_v45  ;;  %v865_v33 = vrot.slane %v846_v26, 4 }
 0x174   : > { %v859_v30 = vrot.slane %v854_v25, 4  ;;  %v864_v31 = vsel %vm517_vm1, %v863_v27, %v846_v26 }
 0x175   : > { %1072 = vmatpush.msra.mxu0 %v864_v31  ;;  %v861_v35 = vrot.slane %v842_v29, 4  ;;  %v866_v36 = vsel %vm517_vm1, %v858_v20, %v865_v33 }
 0x176   : > { %v860_v34 = vsel %vm517_vm1, %v859_v30, %v842_v29  ;;  %1095 = vmatpush.msra.mxu1 %v866_v36 }
 0x177   : > { %1026 = vmatpush.msrb.mxu2 %v860_v34  ;;  %v862_v37 = vsel %vm517_vm1, %v854_v25, %v861_v35 }
 0x178   : > { %1049 = vmatpush.msra.mxu3 %v862_v37 }
 0x1dc   : > { %v969_v40 = vpop.f32.mrf.mxu1 }
 0x1dd   : > { %v943_v38 = vpop.f32.mrf.mxu0  ;;  %v981_v42 = vsel %vm867_vm2, %v969_v40, -inf }
 0x1de   : > { %v978_v39 = vsel %vm867_vm2, %v943_v38, -inf }
 0x1df   : > { %979 = vmax.xlane.f32.xlu2 %v978_v39 }
 0x1e5   : > { %v891_v41 = vpop.f32.mrf.mxu3 }
 0x1e6   : > { %v972_v43 = vsel %vm867_vm2, %v891_v41, -inf }
 0x1e7   : > { %982 = vmax.xlane.f32.xlu2 %v981_v42  ;;  %973 = vmax.xlane.f32.xlu0 %v972_v43 }
 0x1ed   : > { %v917_v44 = vpop.f32.mrf.mxu3 }
 0x1ee   : > { %v975_v46 = vsel %vm867_vm2, %v917_v44, -inf }
 0x1ef   : > { %976 = vmax.xlane.f32.xlu1 %v975_v46 }
 0x252   : > { %v980_v47 = vpop.xlane.xlu2 %979 }
 0x253   : > { %v986_v48 = vsub.f32 %v943_v38, %v980_v47 }
 0x255   : > { %v992_v49 = vmul.f32 1.442695, %v986_v48 }
 0x257   : > { %1579 = vpow2.f32 %v992_v49 }
 0x25a   : > { %v983_v50 = vpop.xlane.xlu2 %982  ;;  %v974_v51 = vpop.xlane.xlu0 %973 }
 0x25b   : > { %v987_v52 = vsub.f32 %v969_v40, %v983_v50  ;;  %v984_v53 = vsub.f32 %v891_v41, %v974_v51 }
 0x25d   : > { %v1580_v54 = vpop.eup %1579  ;;  %v994_v55 = vmul.f32 1.442695, %v987_v52  ;;  %v988_v56 = vmul.f32 1.442695, %v984_v53 }
 0x25e   : > { %1471 = vmatmul.msk.f32.vlgmr.msra.gmra.mxu0 %vm867_vm2, %v1580_v54  ;;  %v1002_v57 = vsel %vm867_vm2, %v1580_v54, 0.0 }
 0x25f   : > { %1581 = vpow2.f32 %v994_v55  ;;  %1003 = vadd.xlane.f32.xlu0 %v1002_v57 }
 0x260   : > { %1583 = vpow2.f32 %v988_v56 }
 0x262   : > { %v977_v58 = vpop.xlane.xlu1 %976 }
 0x263   : > { %v985_v21 = vsub.f32 %v917_v44, %v977_v58 }
 0x265   : > { %v1582_v59 = vpop.eup %1581  ;;  %v990_v60 = vmul.f32 1.442695, %v985_v21 }
 0x266   : > { %v1584_v61 = vpop.eup %1583  ;;  %1472 = vmatmul.msk.f32.vlgmr.msra.gmra.mxu1 %vm867_vm2, %v1582_v59  ;;  %v1005_v62 = vsel %vm867_vm2, %v1582_v59, 0.0 }
 0x267   : > { %1585 = vpow2.f32 %v990_v60  ;;  %1469 = vmatmul.msk.f32.vlgmr.msrb.gmra.mxu2 %vm867_vm2, %v1584_v61  ;;  %1006 = vadd.xlane.f32.xlu2 %v1005_v62  ;;  %v996_v63 = vsel %vm867_vm2, %v1584_v61, 0.0 }
 0x268   : > { %997 = vadd.xlane.f32.xlu1 %v996_v63 }
 0x26d   : > { %v1586_v0 = vpop.eup %1585 }
 0x26e   : > { %1470 = vmatmul.msk.f32.vlgmr.msra.gmra.mxu3 %vm867_vm2, %v1586_v0  ;;  %v999_v1 = vsel %vm867_vm2, %v1586_v0, 0.0 }
 0x26f   : > { %1000 = vadd.xlane.f32.xlu0 %v999_v1 }
 0x2d2   : > { %v1004_v2 = vpop.xlane.xlu0 %1003 }
 0x2d3   : > { %1587 = vrcp.f32 %v1004_v2  ;;  %v1137_v11 = vand.u32 2147483647, %v1004_v2  ;;  %v1139_v12 = vand.u32 2147483648, %v1004_v2  ;;  %vm1133_vm4 = vweird.f32 %v1004_v2 }
 0x2d5   : > { %vm1138_vm6 = vcmp.eq.f32.partialorder %v1137_v11, 8.507059e+37  ;;  %v1140_v20 = vor.u32 1.1754944e-38, %v1139_v12 }
 0x2d9   : > { %v1588_v3 = vpop.eup %1587 }
 0x2da   : > { %v1129_v4 = vmul.f32 %v1588_v3, %v1004_v2  ;;  %v1007_v5 = vpop.xlane.xlu2 %1006  ;;  %vm1134_vm3 = vweird.f32 %v1588_v3 }
 0x2db   : > { %1589 = vrcp.f32 %v1007_v5  ;;  %v998_v6 = vpop.xlane.xlu1 %997  ;;  %vm1135_vm5 = vmor %vm1133_vm4, %vm1134_vm3  ;;  %v1153_v23 = vand.u32 2147483648, %v1007_v5  ;;  %vm1147_vm9 = vweird.f32 %v1007_v5  ;;  %v1151_v29 = vand.u32 2147483647, %v1007_v5  ;;  %v1074_v31 = vpop.f32.mrf.mxu0 }
 0x2dc   : > { %v1130_v7 = vsub.f32 1.0, %v1129_v4  ;;  %1591 = vrcp.f32 %v998_v6  ;;  %v1111_v24 = vand.u32 2147483648, %v998_v6  ;;  %v1109_v27 = vand.u32 2147483647, %v998_v6 }
 0x2dd   : > { %vm1105_vm11 = vweird.f32 %v998_v6  ;;  %v1154_v39 = vor.u32 1.1754944e-38, %v1153_v23  ;;  %vm1152_vm14 = vcmp.eq.f32.partialorder %v1151_v29, 8.507059e+37 }
 0x2de   : > { %v1131_v8 = vmul.f32 %v1588_v3, %v1130_v7  ;;  %v1112_v38 = vor.u32 1.1754944e-38, %v1111_v24  ;;  %vm1110_vm13 = vcmp.eq.f32.partialorder %v1109_v27, 8.507059e+37 }
 0x2e0   : > { %v1132_v9 = vadd.f32 %v1588_v3, %v1131_v8 }
 0x2e1   : > { %v1590_v10 = vpop.eup %1589 }
 0x2e2   : > { %v1592_v13 = vpop.eup %1591  ;;  %v1143_v14 = vmul.f32 %v1590_v10, %v1007_v5  ;;  %v1001_v15 = vpop.xlane.xlu0 %1000  ;;  %v1136_v18 = vsel %vm1135_vm5, %v1588_v3, %v1132_v9  ;;  %vm1148_vm7 = vweird.f32 %v1590_v10 }
 0x2e3   : > { %v1101_v16 = vmul.f32 %v1592_v13, %v998_v6  ;;  %1593 = vrcp.f32 %v1001_v15  ;;  %v1141_v25 = vsel %vm1138_vm6, %v1140_v20, %v1136_v18  ;;  %vm1106_vm8 = vweird.f32 %v1592_v13  ;;  %vm2184_vm10 = vmor %vm1147_vm9, %vm1148_vm7  ;;  %v1097_v51 = vpop.f32.mrf.mxu1 }
 0x2e4   : > { %v1144_v17 = vsub.f32 1.0, %v1143_v14  ;;  %v1158_v35 = vmul.f32 %v1141_v25, %v1074_v31  ;;  %vm1107_vm12 = vmor %vm1105_vm11, %vm1106_vm8  ;;  %v1125_v47 = vand.u32 2147483648, %v1001_v15  ;;  %v1123_v50 = vand.u32 2147483647, %v1001_v15 }
 0x2e5   : > { %v1102_v19 = vsub.f32 1.0, %v1101_v16  ;;  %vm1119_vm3 = vweird.f32 %v1001_v15  ;;  %vm1283_vm6 = vcmask 130048   ;;  %vm1285_vm7 = vcmask 195584  }
 0x2e6   : > { %v1145_v22 = vmul.f32 %v1590_v10, %v1144_v17  ;;  %v1160_v48 = vrot.slane %v1158_v35, 4  ;;  %v1126_v56 = vor.u32 1.1754944e-38, %v1125_v47  ;;  %vm1124_vm5 = vcmp.eq.f32.partialorder %v1123_v50, 8.507059e+37 }
 0x2e7   : > { %v1103_v26 = vmul.f32 %v1592_v13, %v1102_v19 }
 0x2e8   : > { %v1146_v28 = vadd.f32 %v1590_v10, %v1145_v22 }
 0x2e9   : > { %v1594_v30 = vpop.eup %1593  ;;  %v1104_v34 = vadd.f32 %v1592_v13, %v1103_v26 }
 0x2ea   : > { %v1115_v36 = vmul.f32 %v1594_v30, %v1001_v15  ;;  %v1150_v37 = vsel %vm2184_vm10, %v1590_v10, %v1146_v28  ;;  %v1028_v42 = vpop.f32.mrf.mxu2  ;;  %vm1120_vm15 = vweird.f32 %v1594_v30 }
 0x2eb   : > { %v1108_v40 = vsel %vm1107_vm12, %v1592_v13, %v1104_v34  ;;  %v1155_v44 = vsel %vm1152_vm14, %v1154_v39, %v1150_v37  ;;  %vm1121_vm4 = vmor %vm1119_vm3, %vm1120_vm15 }
 0x2ec   : > { %v1116_v41 = vsub.f32 1.0, %v1115_v36  ;;  %v1113_v43 = vsel %vm1110_vm13, %v1112_v38, %v1108_v40  ;;  %v1159_v53 = vmul.f32 %v1155_v44, %v1097_v51 }
 0x2ed   : > { %v1156_v46 = vmul.f32 %v1113_v43, %v1028_v42 }
 0x2ee   : > { %v1117_v49 = vmul.f32 %v1594_v30, %v1116_v41  ;;  %v1172_v61 = vrot.slane %v1159_v53, 4 }
 0x2ef   : > { %v1162_v52 = vrot.slane %v1156_v46, 4  ;;  %v1161_v54 = vsel %vm517_vm1, %v1160_v48, %v1156_v46 }
 0x2f0   : > { %v1118_v55 = vadd.f32 %v1594_v30, %v1117_v49  ;;  %v1167_v21 = vperm.slane %v1161_v54, %v2039_v32 }
 0x2f1   : > { %v1163_v57 = vsel %vm517_vm1, %v1158_v35, %v1162_v52  ;;  %v1051_v59 = vpop.f32.mrf.mxu3 }
 0x2f2   : > { %v1122_v58 = vsel %vm1121_vm4, %v1594_v30, %v1118_v55  ;;  %v1171_v63 = vperm.slane %v1163_v57, %v2039_v32  ;;  %v1186_v2 = vrot.slane %v1167_v21, 4  ;;  %v1290_v57 = vld [vmem:[#allocation10 + $0x18] sm:$0xff] }
 0x2f3   : > { %v1127_v60 = vsel %vm1124_vm5, %v1126_v56, %v1122_v58  ;;  %v1289_v58 = vld [vmem:[#allocation10 + $0x10] sm:$0xff]  ;;  %1309 = vmatpush.msra.mxu2 %v1290_v57 }
 0x2f4   : > { %v1157_v62 = vmul.f32 %v1127_v60, %v1051_v59  ;;  %v1198_v5 = vrot.slane %v1171_v63, 4 }
 0x2f5   : > { %1310 = vmatpush.msra.mxu2 %v1289_v58 }
 0x2f6   : > { %v1173_v0 = vsel %vm517_vm1, %v1172_v61, %v1157_v62  ;;  %v1174_v1 = vrot.slane %v1157_v62, 4 }
 0x2f7   : > { %v1179_v3 = vperm.slane %v1173_v0, %v2039_v32 }
 0x2f8   : > { %v1175_v4 = vsel %vm517_vm1, %v1159_v53, %v1174_v1  ;;  %v1578_v1 = vld [vmem:[%s2279_s8] ss:$0 sm:$0xff] }
 0x2f9   : > { %v1183_v6 = vperm.slane %v1175_v4, %v2039_v32  ;;  %v1184_v7 = vrot.slane %v1179_v3, 4  ;;  %v1187_v8 = vsel %vm517_vm1, %v1179_v3, %v1186_v2 }
 0x2fa   : > { %v1195_v9 = vperm.slane %v1187_v8, %v2048_v45 }
 0x2fb   : > { %v1185_v10 = vsel %vm517_vm1, %v1184_v7, %v1167_v21  ;;  %v1196_v11 = vrot.slane %v1183_v6, 4  ;;  %v1199_v12 = vsel %vm517_vm1, %v1183_v6, %v1198_v5  ;;  %v1287_v21 = vld [vmem:[#allocation10] sm:$0xff] }
 0x2fc   : > { %v1191_v13 = vperm.slane %v1185_v10, %v2048_v45  ;;  %v1207_v14 = vperm.slane %v1199_v12, %v2048_v45  ;;  %v1210_v15 = vrot.slane %v1195_v9, 4 }
 0x2fd   : > { %v1197_v16 = vsel %vm517_vm1, %v1196_v11, %v1171_v63 }
 0x2fe   : > { %v1203_v17 = vperm.slane %v1197_v16, %v2048_v45  ;;  %v1208_v18 = vrot.slane %v1191_v13, 4  ;;  %v1211_v19 = vsel %vm517_vm1, 0.0, %v1210_v15  ;;  %v1214_v20 = vrot.slane %v1207_v14, 4 }
 0x2ff   : > { %v1216_v22 = vsel %vm517_vm1, %v1210_v15, %v1191_v13  ;;  %v1221_v23 = vrot.slane %v1211_v19, 4 }
 0x300   : > { %v1215_v24 = vsel %vm517_vm1, 0.0, %v1214_v20  ;;  %v1209_v25 = vsel %vm517_vm1, 0.0, %v1208_v18  ;;  %v1212_v26 = vrot.slane %v1203_v17, 4  ;;  %v1220_v27 = vperm.slane %v1216_v22, %v2039_v32 }
 0x301   : > { %v1232_v28 = vrot.slane %v1215_v24, 4  ;;  %v1222_v29 = vsel %vm517_vm1, %v1221_v23, %v1209_v25  ;;  %v1227_v30 = vsel %vm517_vm1, %v1214_v20, %v1203_v17 }
 0x302   : > { %v1213_v31 = vsel %vm517_vm1, 0.0, %v1212_v26  ;;  %v1226_v33 = vperm.slane %v1222_v29, %v2039_v32  ;;  %v1231_v34 = vperm.slane %v1227_v30, %v2039_v32  ;;  %v1240_v35 = vrot.slane %v1220_v27, 4 }
 0x303   : > { %v1233_v36 = vsel %vm517_vm1, %v1232_v28, %v1213_v31 }
 0x304   : > { %v1237_v37 = vperm.slane %v1233_v36, %v2039_v32  ;;  %v1241_v38 = vsel %vm517_vm1, %v1226_v33, %v1240_v35  ;;  %v1252_v39 = vrot.slane %v1231_v34, 4  ;;  %v1238_v40 = vrot.slane %v1226_v33, 4 }
 0x305   : > { %v1249_v41 = vperm.slane %v1241_v38, %v2048_v45 }
 0x306   : > { %v1253_v42 = vsel %vm517_vm1, %v1237_v37, %v1252_v39  ;;  %v1239_v43 = vsel %vm517_vm1, %v1238_v40, %v1220_v27  ;;  %v1250_v44 = vrot.slane %v1237_v37, 4 }
 0x307   : > { %v1261_v46 = vperm.slane %v1253_v42, %v2048_v45  ;;  %v1268_v47 = vrot.slane %v1249_v41, 4  ;;  %v1245_v48 = vperm.slane %v1239_v43, %v2048_v45 }
 0x308   : > { %v1251_v49 = vsel %vm517_vm1, %v1250_v44, %v1231_v34 }
 0x309   : > { %v1269_v32 = vsel %vm517_vm1, %v1261_v46, %v1268_v47  ;;  %v1266_v50 = vrot.slane %v1261_v46, 4  ;;  %v1257_v51 = vperm.slane %v1251_v49, %v2048_v45  ;;  %v1264_v52 = vrot.slane %v1245_v48, 4  ;;  %v1288_v45 = vld [vmem:[#allocation10 + $0x8] sm:$0xff] }
 0x30a   : > { %1279 = vrot.lane.b32.xlu0 %v1269_v32, %s1832_s24  ;;  %1311 = vmatpush.msra.mxu2 %v1288_v45 }
 0x30b   : > { %v1267_v53 = vsel %vm517_vm1, %v1266_v50, %v1249_v41  ;;  %v1262_v54 = vrot.slane %v1257_v51, 4  ;;  %v1265_v55 = vsel %vm517_vm1, %v1257_v51, %v1264_v52 }
 0x30c   : > { %1275 = vrot.lane.b32.xlu2 %v1267_v53, %s1833_s15  ;;  %1271 = vrot.lane.b32.xlu1 %v1265_v55, %s1834_s14 }
 0x30d   : > { %v1263_v56 = vsel %vm517_vm1, %v1262_v54, %v1245_v48  ;;  %1312 = vmatpush.msra.mxu2 %v1287_v21 }
 0x366   : > { %v1276_v60 = vpop.permute.xlu2 %1275 }
 0x37c   : > { %v1280_v62 = vpop.permute.xlu0 %1279 }
 0x37e   : > { %v1272_v59 = vpop.permute.xlu1 %1271 }
 0x37f   : > { %v1282_v61 = vsel %vm867_vm2, %v1263_v56, %v1272_v59 }
 0x380   : > { %v1284_v63 = vsel %vm1283_vm6, %v1282_v61, %v1276_v60 }
 0x381   : > { %v1286_v0 = vsel %vm1285_vm7, %v1284_v63, %v1280_v62 }
 0x382   : > { %1473 = vmatmul.msk.f32.vlgmr.msra.gmra.mxu2 %vm428_vm0, %v1286_v0 }
 0x405   : > { %v1314_v2 = vpop.f32.mrf.mxu2 }
 0x406   : > { %v1315_v3 = vadd.f32 %v1578_v1, %v1314_v2 }
 0x408   : > { %1317 = vst.msk [vmem:[%s415_s23] sm:$0xff] %vm428_vm0, %v1315_v3 }
 0x409   : > { %1772 = shalt.err (!%p1769_p9)
}
 0x40a   : > { %1496 = dma.vmem_to_hbm [thread:$0]  (%p1972_p4), %s1332_s28, 128, %s1334_s22, %s1319_s16  }
 0x40b PF: > { %s1345_s29 = sand.u32 1, %s1807_s30   ;;  %p2298_p10 = scmp.ge.s32.totalorder %s1819_s12, 2 }
 0x40c   : > { %s1346_s5 = scalar_lea.sflag [#allocation4], %s1345_s29 }
 0x40d   : > { %p1516_p13 = pnand %p2298_p10, %p1976_p6 }
 0x40f   : > { %p1517_p11 = pneg %p1516_p13 }
 0x411   : > { %1802 = dma.done.wait (%p1517_p11), %s1346_s5, 128  }
 0x412   : > { %1804 = vsyncadd (%p1517_p11), %s1346_s5, 4294967168  ;;  %p24_p0 = scmp.ge.s32.totalorder %s1946_s25, 4   ;;  %s2299_s30 = smov %s1811_s10 }
 0x413   : > { %s2300_s10 = smov %s1815_s11  ;;  %s2301_s11 = smov %s1957_s26 }
 0x414   : > { %s2302_s12 = smov %s1946_s25  ;;  %26 = sbr.rel (!%p24_p0) target bundleno = 12 (0xc), region = 117 }
 0x419   :  { %1352 = vsyncpa [#allocation3], 1 }
 0x41a   :  { %1354 = vsyncpa [#allocation3 + $0x1], 1 }
 0x41b   :  { %1355 = vsyncpa [#allocation6], 1 }
 0x41c   :  { %1356 = vsyncpa [#allocation9], 1 }
 0x41d   :  { %1357 = vsyncpa [#allocation4], 1 }
 0x41e   :  { %1359 = vsyncpa [#allocation4 + $0x1], 1 }

// kernel: tpu_custom_call.1
= control target key start
LH: loop header
LB: loop body
LE: loop exit
PB: predicated region body
PF: predicated region fallthrough
CT: control target
= control target key end

     0   :  { %s2271_s0 = inlined_call_operand.hbm [shape: f32[2,8,32], index: 0, kind: input, shape index: {}]   ;;  %s2272_s1 = inlined_call_operand.hbm [shape: f32[32,32], index: 1, kind: input, shape index: {}]   ;;  %s2273_s2 = inlined_call_operand.vmem [shape: f32[1,32], index: 2, kind: input, shape index: {}]   ;;  %s2274_s3 = inlined_call_operand.hbm [shape: f32[32,32], index: 3, kind: input, shape index: {}]   ;;  %s2275_s4 = inlined_call_operand.vmem [shape: f32[1,32], index: 4, kind: input, shape index: {}]   ;;  %s2276_s5 = inlined_call_operand.hbm [shape: f32[32,32], index: 5, kind: input, shape index: {}]   ;;  %s2277_s6 = inlined_call_operand.vmem [shape: f32[1,32], index: 6, kind: input, shape index: {}]   ;;  %s2278_s7 = inlined_call_operand.hbm [shape: f32[32,32], index: 7, kind: input, shape index: {}]   ;;  %s2279_s8 = inlined_call_operand.vmem [shape: f32[1,32], index: 8, kind: input, shape index: {}]   ;;  %s2280_s9 = inlined_call_operand.hbm [shape: f32[2,8,32], index: 9, kind: output, shape index: {}]  }
   0x1   :  { %2281 = sst [smem:[#allocation16_spill]] %s2272_s1 }
   0x2   :  { %2282 = sst [smem:[#allocation17_spill]] %s2274_s3 }
   0x3   :  { %2283 = sst [smem:[#allocation18_spill]] %s2276_s5 }
   0x4   :  { %2284 = sst [smem:[#allocation19_spill]] %s2278_s7 }
   0x5   :  { %14 = vsyncpa [#allocation3], 0 }
   0x6   :  { %16 = vsyncpa [#allocation3 + $0x1], 0 }
   0x7   :  { %17 = vsyncpa [#allocation6], 0 }
   0x8   :  { %18 = vsyncpa [#allocation9], 0 }
   0x9   :  { %19 = vsyncpa [#allocation4], 0 }
   0xa   :  { %21 = vsyncpa [#allocation4 + $0x1], 0  ;;  %s1885_s30 = smov 0   ;;  %s1887_s10 = smov 0  }
   0xb   :  { %s1889_s11 = smov 0   ;;  %s1891_s12 = smov 0  }
   0xc LB: > { %s2285_s1 = sld [smem:[#allocation16_spill]]  ;;  %s1909_s16 = sadd.s32 4294967295, %s1819_s12   ;;  %s1819_s12 = sphi %s1891_s12, %s2302_s12   ;;  %s1815_s11 = sphi %s1889_s11, %s2301_s11   ;;  %s1811_s10 = sphi %s1887_s10, %s2300_s10   ;;  %s1807_s30 = sphi %s1885_s30, %s2299_s30  }
   0xd   : > { %p1443_p0 = scmp.ge.s32.totalorder %s1819_s12, 1  ;;  %p48_p1 = scmp.eq.s32.totalorder %s1909_s16, 0 }
   0xe   : > { %p252_p2 = scmp.lt.s32.totalorder %s1819_s12, 3  ;;  %s1821_s18 = smov [#allocation5]  }
   0xf   : > { %s265_s19 = sshll.u32 %s1821_s18, 4  ;;  %s2287_s5 = sld [smem:[#allocation18_spill]]  ;;  %s266_s19 = int_to_ptr.vmem [resolvable:$true] %s265_s19 }
  0x10   : > { %p1914_p3 = pnand %p1443_p0, %p252_p2  ;;  %s2289_s3 = sld [smem:[#allocation17_spill]] }
  0x11   : > { %s1822_s27 = smov [#allocation8]   ;;  %s1823_s29 = smov 128  }
  0x12   : > { %s263_s15 = sshll.u32 %s2285_s1, 4  ;;  %p1498_p4 = pneg %p1914_p3  ;;  %s264_s15 = int_to_ptr.hbm [resolvable:$true] %s263_s15 }
  0x13   : > { %s299_s28 = sshll.u32 %s1822_s27, 4  ;;  %s1824_s13 = smov 8   ;;  %s300_s28 = int_to_ptr.vmem [resolvable:$true] %s299_s28 }
  0x14   : > { %p1926_p6 = pnand %p1498_p4, %p48_p1  ;;  %s2290_s7 = sld [smem:[#allocation19_spill]] }
  0x15   : > { %s297_s22 = sshll.u32 %s2287_s5, 4  ;;  %s1825_s21 = smov [#allocation7]   ;;  %s298_s22 = int_to_ptr.hbm [resolvable:$true] %s297_s22 }
  0x16   : > { %s280_s26 = sshll.u32 %s2289_s3, 4  ;;  %s282_s24 = sshll.u32 %s1825_s21, 4  ;;  %s281_s26 = int_to_ptr.hbm [resolvable:$true] %s280_s26  ;;  %s283_s24 = int_to_ptr.vmem [resolvable:$true] %s282_s24 }
  0x17   : > { %1501 = dma.hbm_to_vmem [thread:$0]  (!%p1926_p6), %s264_s15, 512, %s266_s19, [#allocation6], %s1823_s29, %s1823_s29, %s1824_s13  }
  0x18   : > { %1507 = dma.hbm_to_vmem [thread:$0]  (!%p1926_p6), %s298_s22, 512, %s300_s28, [#allocation9], %s1823_s29, %s1823_s29, %s1824_s13  }
  0x19   : > { %1504 = dma.hbm_to_vmem [thread:$0]  (!%p1926_p6), %s281_s26, 512, %s283_s24, [#allocation6], %s1823_s29, %s1823_s29, %s1824_s13  }
  0x1a   : > { %s314_s20 = sshll.u32 %s2290_s7, 4  ;;  %s1826_s15 = smov [#allocation10]   ;;  %s315_s20 = int_to_ptr.hbm [resolvable:$true] %s314_s20 }
  0x1b   : > { %s316_s19 = sshll.u32 %s1826_s15, 4  ;;  %s1442_s22 = sadd.s32 4294967294, %s1819_s12   ;;  %s317_s19 = int_to_ptr.vmem [resolvable:$true] %s316_s19 }
  0x1c   : > { %1510 = dma.hbm_to_vmem [thread:$0]  (!%p1926_p6), %s315_s20, 512, %s317_s19, [#allocation9], %s1823_s29, %s1823_s29, %s1824_s13  }
  0x1d   : > { %s1946_s25 = sadd.s32 1, %s1819_s12   ;;  %s34_s28 = sadd.s32 1, %s1815_s11 }
  0x1e   : > { %s31_s27 = ssub.s32 %s1819_s12, %s1946_s25  ;;  %p41_p8 = scmp.ne.s32.totalorder %s1815_s11, %s1811_s10 }
  0x1f   : > { %p32_p7 = scmp.eq.s32.totalorder %s31_s27, 0  ;;  %p42_p9 = scmp.eq.s32.totalorder %s1819_s12, 0 }
  0x20   : > { %p47_p10 = scmp.ne.s32.totalorder %s1811_s10, %s1807_s30  ;;  %p239_p13 = scmp.eq.s32.totalorder %s1909_s16, 1 }
  0x21   : > { %s1957_s26 = scalar_select %p32_p7, %s1815_s11, %s34_s28  }
  0x22   : > { %p1959_p11 = por %p42_p9, %p41_p8  ;;  %p1965_p12 = por %p48_p1, %p47_p10 }
  0x23   : > { %p245_p0 = scmp.eq.s32.totalorder %s1442_s22, 1  ;;  %p1523_p2 = scmp.lt.s32.totalorder %s1819_s12, 2 }
  0x24   : > { %s333_s29 = sand.u32 1, %s1815_s11   ;;  %p1972_p4 = por %p239_p13, %p41_p8 }
  0x25   : > { %p1976_p6 = por %p245_p0, %p47_p10  ;;  %s1449_s20 = sshll.u32 %s333_s29, 3 }
  0x26   : > { %s1450_s21 = sshll.u32 %s1819_s12, 3  ;;  %s337_s27 = scalar_lea.vmem [#allocation2], %s1449_s20 }
  0x27   : > { %s341_s19 = scalar_lea.hbm %s2271_s0, %s1450_s21  ;;  %s345_s28 = sshll.u32 %s337_s27, 4  ;;  %s346_s28 = int_to_ptr.vmem [resolvable:$true] %s345_s28 }
  0x28   : > { %s343_s1 = sshll.u32 %s341_s19, 4  ;;  %p1986_p7 = pnand %p1523_p2, %p1959_p11  ;;  %s344_s1 = int_to_ptr.hbm [resolvable:$true] %s343_s1 }
  0x29   : > { %s334_s3 = scalar_lea.sflag [#allocation3], %s333_s29  ;;  %s1715_s5 = sshra.s32 %s344_s1, 4  ;;  %s1716_s5 = int_to_ptr.hbm [resolvable:$true] %s1715_s5 }
  0x2a   : > { %s1717_s7 = scalar_lea.hbm %s1716_s5, 8  ;;  %p1719_p9 = pneg %p1986_p7 }
  0x2b   : > { %p1718_p8 = scmp.ne.s32.totalorder %s1716_s5, %s1717_s7  ;;  %s1722_s24 = scalar_lea.hbm %s2271_s0, 16 }
  0x2c   : > { %p1723_p11 = scmp.lt.s32.totalorder %s1716_s5, %s2271_s0  ;;  %p1724_p0 = scmp.lt.s32.totalorder %s1722_s24, %s1717_s7 }
  0x2d   : > { %p1720_p10 = pnand %p1719_p9, %p1718_p8 }
  0x2e   : > { %p1725_p2 = por %p1724_p0, %p1723_p11 }
  0x2f   : > { %p1721_p13 = pneg %p1720_p10 }
  0x31   : > { %p1726_p5 = pnand %p1725_p2, %p1721_p13 }
  0x33   : > { %1729 = shalt.err (!%p1726_p5)
}
  0x34   : > { %1514 = dma.hbm_to_vmem [thread:$0]  (!%p1986_p7), %s344_s1, 128, %s346_s28, %s334_s3  }
  0x35   : > { %354 = sbr.rel (%p1914_p3) target bundleno = 1035 (0x40b), region = 56  ;;  %s2003_s29 = sand.u32 (!%p1914_p3), 1, %s1811_s10  }
  0x36   : > { %s1452_s19 = sshll.u32 (!%p1914_p3), %s2003_s29, 3  ;;  %s357_s27 = scalar_lea.sflag (!%p1914_p3), [#allocation3], %s2003_s29 }
  0x37   : > { %s360_s5 = scalar_lea.vmem (!%p1914_p3), [#allocation2], %s1452_s19 }
  0x3a   : > { %1790 = dma.done.wait (%p1965_p12), %s357_s27, 128  }
  0x3b   : > { %1792 = vsyncadd (%p1965_p12), %s357_s27, 4294967168 }
  0x3c   : > { %1794 = dma.done.wait (%p48_p1), [#allocation6], 1024  }
  0x3d   : > { %1796 = vsyncadd (%p48_p1), [#allocation6], 4294966272 }
  0x3e   : > { %1798 = dma.done.wait (%p48_p1), [#allocation9], 1024  }
  0x3f   : > { %1800 = vsyncadd (%p48_p1), [#allocation9], 4294966272  ;;  %v424_v0 = vld [vmem:[#allocation5 + $0x18] sm:$0xff]  ;;  %v423_v2 = vld [vmem:[#allocation5 + $0x10] sm:$0xff]  ;;  %vm428_vm0 = vcmask 261120   ;;  %s1827_s23 = smov 104  }
  0x40   : > { %v455_v1 = vld [vmem:[#allocation7 + $0x18] sm:$0xff]  ;;  %444 = vmatpush.msra.mxu0 %v424_v0  ;;  %v454_v3 = vld [vmem:[#allocation7 + $0x10] sm:$0xff]  ;;  %v422_v4 = vld [vmem:[#allocation5 + $0x8] sm:$0xff]  ;;  %s1828_s28 = smov 120   ;;  %s1829_s22 = smov 112   ;;  %vm517_vm1 = vcmask 1047556  }
  0x41   : > { %471 = vmatpush.msra.mxu1 %v455_v1  ;;  %v453_v5 = vld [vmem:[#allocation7 + $0x8] sm:$0xff]  ;;  %v421_v6 = vld [vmem:[#allocation5] sm:$0xff]  ;;  %v482_v7 = vld [vmem:[#allocation8 + $0x18] sm:$0xff]  ;;  %v1830_v23 = vmov 1983009808   ;;  %vm867_vm2 = vcmask 64512  }
  0x42   : > { %445 = vmatpush.msra.mxu0 %v423_v2  ;;  %v481_v8 = vld [vmem:[#allocation8 + $0x10] sm:$0xff]  ;;  %v452_v9 = vld [vmem:[#allocation7] sm:$0xff]  ;;  %498 = vmatpush.msra.mxu2 %v482_v7  ;;  %v480_v11 = vld [vmem:[#allocation8 + $0x8] sm:$0xff]  ;;  %v522_v24 = vunpack.c.l.s4 %v1830_v23  ;;  %v1831_v36 = vmov 1934713408   ;;  %s1832_s24 = smov 24  }
  0x43   : > { %472 = vmatpush.msra.mxu1 %v454_v3  ;;  %v416_v10 = vld [vmem:[%s360_s5] sm:$0xff]  ;;  %v479_v12 = vld [vmem:[#allocation8] sm:$0xff]  ;;  %v546_v37 = vunpack.c.l.s4 %v1831_v36  ;;  %s1833_s15 = smov 16   ;;  %s1834_s14 = smov 8  }
  0x44   : > { %446 = vmatpush.msra.mxu0 %v422_v4  ;;  %499 = vmatpush.msra.mxu2 %v481_v8  ;;  %v1575_v13 = vld [vmem:[%s2273_s2] ss:$0 sm:$0xff]  ;;  %v2039_v32 = vunpack.c.0.s8 %v522_v24  ;;  %s1475_s27 = sshll.u32 %s1909_s16, 3  ;;  %s1319_s16 = scalar_lea.sflag [#allocation4], %s2003_s29 }
  0x45   : > { %473 = vmatpush.msra.mxu1 %v453_v5  ;;  %v1576_v14 = vld [vmem:[%s2275_s4] ss:$0 sm:$0xff]  ;;  %v2048_v45 = vunpack.c.0.s8 %v546_v37  ;;  %s1329_s3 = scalar_lea.hbm %s2280_s9, %s1475_s27 }
  0x46   : > { %447 = vmatpush.msra.mxu0 %v421_v6  ;;  %500 = vmatpush.msra.mxu2 %v480_v11  ;;  %v1577_v19 = vld [vmem:[%s2277_s6] ss:$0 sm:$0xff] }
  0x47   : > { %474 = vmatpush.msra.mxu1 %v452_v9  ;;  %1458 = vmatmul.msk.f32.vlgmr.msra.gmra.mxu0 %vm428_vm0, %v416_v10 }
  0x48   : > { %1459 = vmatmul.msk.f32.vlgmr.msra.gmra.mxu1 %vm428_vm0, %v416_v10  ;;  %501 = vmatpush.msra.mxu2 %v479_v12 }
  0x49   : > { %1460 = vmatmul.msk.f32.vlgmr.msra.gmra.mxu2 %vm428_vm0, %v416_v10 }
  0xc4   : > { %v449_v15 = vpop.f32.mrf.mxu0 }
  0xc5   : > { %v476_v16 = vpop.f32.mrf.mxu1  ;;  %v450_v17 = vadd.f32 %v1575_v13, %v449_v15 }
  0xc6   : > { %v477_v18 = vadd.f32 %v1576_v14, %v476_v16 }
  0xc7   : > { %510 = vrot.lane.b32.xlu2 %v450_v17, %s1829_s22  ;;  %v519_v30 = vrot.slane %v450_v17, 4 }
  0xc8   : > { %634 = vrot.lane.b32.xlu1 %v477_v18, %s1827_s23  ;;  %628 = vrot.lane.b32.xlu0 %v477_v18, %s1828_s28  ;;  %v639_v43 = vrot.slane %v477_v18, 4 }
  0xcc   : > { %v503_v20 = vpop.f32.mrf.mxu2 }
  0xcd   : > { %v2033_v21 = vadd.f32 %v1577_v19, %v503_v20 }
  0xcf   : > { %513 = vrot.lane.b32.xlu2 %v450_v17, %s1827_s23 }
  0xd0   : > { %631 = vrot.lane.b32.xlu0 %v477_v18, %s1829_s22  ;;  %507 = vrot.lane.b32.xlu1 %v450_v17, %s1828_s28 }
  0xd7   : > { %754 = vrot.lane.b32.xlu2 %v2033_v21, %s1827_s23  ;;  %s415_s23 = scalar_lea.vmem [#allocation11], %s1452_s19  ;;  %s1765_s19 = scalar_lea.hbm %s2280_s9, 16 }
  0xd8   : > { %748 = vrot.lane.b32.xlu0 %v2033_v21, %s1828_s28  ;;  %751 = vrot.lane.b32.xlu1 %v2033_v21, %s1829_s22  ;;  %s1331_s28 = sshll.u32 %s415_s23, 4  ;;  %s1333_s22 = sshll.u32 %s1329_s3, 4  ;;  %s1332_s28 = int_to_ptr.vmem [resolvable:$true] %s1331_s28  ;;  %s1334_s22 = int_to_ptr.hbm [resolvable:$true] %s1333_s22 }
  0xd9   : > { %s1759_s20 = sshra.s32 %s1334_s22, 4  ;;  %s1760_s20 = int_to_ptr.hbm [resolvable:$true] %s1759_s20 }
  0xda   : > { %s1761_s21 = scalar_lea.hbm %s1760_s20, 8  ;;  %p1766_p12 = scmp.lt.s32.totalorder %s1760_s20, %s2280_s9 }
  0xdb   : > { %p1762_p1 = scmp.ne.s32.totalorder %s1760_s20, %s1761_s21  ;;  %p1767_p7 = scmp.lt.s32.totalorder %s1765_s19, %s1761_s21 }
  0xdd   : > { %p1763_p3 = pnand %p1762_p1, %p1972_p4  ;;  %p1768_p8 = por %p1767_p7, %p1766_p12 }
  0xdf   : > { %p1764_p5 = pneg %p1763_p3 }
  0xe1   : > { %p1769_p9 = pnand %p1768_p8, %p1764_p5 }
 0x121   : > { %v511_v22 = vpop.permute.xlu2 %510 }
 0x122   : > { %v516_v25 = vrot.slane %v511_v22, 4  ;;  %v520_v38 = vsel %vm517_vm1, %v511_v22, %v519_v30 }
 0x123   : > { %v528_v44 = vperm.slane %v520_v38, %v2039_v32 }
 0x124   : > { %v518_v33 = vsel %vm517_vm1, %v516_v25, %v450_v17 }
 0x125   : > { %v524_v40 = vperm.slane %v518_v33, %v2039_v32  ;;  %v555_v63 = vrot.slane %v528_v44, 4 }
 0x127   : > { %v543_v55 = vrot.slane %v524_v40, 4 }
 0x129   : > { %v514_v34 = vpop.permute.xlu2 %513 }
 0x12a   : > { %v529_v41 = vrot.slane %v514_v34, 4 }
 0x13a   : > { %v635_v26 = vpop.permute.xlu1 %634  ;;  %v629_v27 = vpop.permute.xlu0 %628 }
 0x13b   : > { %v649_v28 = vrot.slane %v635_v26, 4  ;;  %v651_v29 = vrot.slane %v629_v27, 4 }
 0x13d   : > { %v652_v31 = vsel %vm517_vm1, %v635_v26, %v651_v29  ;;  %v650_v35 = vsel %vm517_vm1, %v649_v28, %v629_v27 }
 0x13e   : > { %v660_v39 = vperm.slane %v652_v31, %v2039_v32  ;;  %v656_v42 = vperm.slane %v650_v35, %v2039_v32 }
 0x140   : > { %v673_v52 = vrot.slane %v660_v39, 4  ;;  %v661_v56 = vrot.slane %v656_v42, 4 }
 0x142   : > { %v632_v46 = vpop.permute.xlu0 %631  ;;  %v508_v47 = vpop.permute.xlu1 %507 }
 0x143   : > { %v637_v48 = vrot.slane %v632_v46, 4  ;;  %v640_v49 = vsel %vm517_vm1, %v632_v46, %v639_v43  ;;  %v530_v50 = vsel %vm517_vm1, %v529_v41, %v508_v47  ;;  %v531_v51 = vrot.slane %v508_v47, 4 }
 0x144   : > { %v648_v53 = vperm.slane %v640_v49, %v2039_v32  ;;  %v536_v54 = vperm.slane %v530_v50, %v2039_v32 }
 0x145   : > { %v638_v57 = vsel %vm517_vm1, %v637_v48, %v477_v18  ;;  %v532_v58 = vsel %vm517_vm1, %v514_v34, %v531_v51 }
 0x146   : > { %v644_v59 = vperm.slane %v638_v57, %v2039_v32  ;;  %v674_v60 = vsel %vm517_vm1, %v673_v52, %v648_v53  ;;  %v675_v61 = vrot.slane %v648_v53, 4  ;;  %v540_v62 = vperm.slane %v532_v58, %v2039_v32 }
 0x147   : > { %v680_v0 = vperm.slane %v674_v60, %v2048_v45  ;;  %v541_v1 = vrot.slane %v536_v54, 4  ;;  %v544_v2 = vsel %vm517_vm1, %v536_v54, %v543_v55 }
 0x148   : > { %v662_v3 = vsel %vm517_vm1, %v661_v56, %v644_v59  ;;  %v663_v4 = vrot.slane %v644_v59, 4  ;;  %v676_v5 = vsel %vm517_vm1, %v660_v39, %v675_v61  ;;  %v552_v6 = vperm.slane %v544_v2, %v2048_v45 }
 0x149   : > { %v668_v7 = vperm.slane %v662_v3, %v2048_v45  ;;  %v684_v8 = vperm.slane %v676_v5, %v2048_v45  ;;  %v689_v9 = vrot.slane %v680_v0, 4  ;;  %v542_v10 = vsel %vm517_vm1, %v541_v1, %v524_v40 }
 0x14a   : > { %v664_v11 = vsel %vm517_vm1, %v656_v42, %v663_v4  ;;  %v548_v12 = vperm.slane %v542_v10, %v2048_v45  ;;  %v553_v13 = vrot.slane %v540_v62, 4  ;;  %v556_v14 = vsel %vm517_vm1, %v540_v62, %v555_v63 }
 0x14b   : > { %v672_v15 = vperm.slane %v664_v11, %v2048_v45  ;;  %v685_v16 = vrot.slane %v668_v7, 4  ;;  %v690_v17 = vsel %vm517_vm1, 0.0, %v689_v9  ;;  %v691_v18 = vrot.slane %v684_v8, 4 }
 0x14c   : > { %v554_v19 = vsel %vm517_vm1, %v553_v13, %v528_v44  ;;  %v564_v20 = vperm.slane %v556_v14, %v2048_v45  ;;  %v565_v22 = vrot.slane %v548_v12, 4  ;;  %v567_v23 = vrot.slane %v552_v6, 4 }
 0x14d   : > { %v687_v24 = vrot.slane %v672_v15, 4  ;;  %v692_v25 = vsel %vm517_vm1, 0.0, %v691_v18  ;;  %v704_v26 = vsel %vm517_vm1, %v691_v18, %v680_v0  ;;  %v560_v27 = vperm.slane %v554_v19, %v2048_v45 }
 0x14e   : > { %v708_v28 = vperm.slane %v704_v26, %v2039_v32  ;;  %v709_v29 = vrot.slane %v692_v25, 4  ;;  %v566_v30 = vsel %vm517_vm1, 0.0, %v565_v22  ;;  %v568_v31 = vsel %vm517_vm1, 0.0, %v567_v23 }
 0x14f   : > { %v688_v33 = vsel %vm517_vm1, 0.0, %v687_v24  ;;  %v569_v34 = vrot.slane %v560_v27, 4  ;;  %v571_v35 = vrot.slane %v564_v20, 4  ;;  %v573_v36 = vsel %vm517_vm1, %v567_v23, %v548_v12 }
 0x150   : > { %v710_v37 = vsel %vm517_vm1, %v709_v29, %v690_v17  ;;  %v577_v38 = vperm.slane %v573_v36, %v2039_v32  ;;  %v578_v39 = vrot.slane %v568_v31, 4  ;;  %v686_v40 = vsel %vm517_vm1, 0.0, %v685_v16 }
 0x151   : > { %v572_v41 = vsel %vm517_vm1, 0.0, %v571_v35  ;;  %v584_v42 = vsel %vm517_vm1, %v571_v35, %v560_v27  ;;  %v693_v43 = vsel %vm517_vm1, %v687_v24, %v668_v7  ;;  %v698_v44 = vrot.slane %v688_v33, 4  ;;  %v755_v35 = vpop.permute.xlu2 %754 }
 0x152   : > { %v589_v46 = vrot.slane %v572_v41, 4  ;;  %v697_v47 = vperm.slane %v693_v43, %v2039_v32  ;;  %v714_v48 = vperm.slane %v710_v37, %v2039_v32  ;;  %v729_v49 = vrot.slane %v708_v28, 4 }
 0x153   : > { %v699_v50 = vsel %vm517_vm1, %v698_v44, %v686_v40  ;;  %v570_v51 = vsel %vm517_vm1, 0.0, %v569_v34  ;;  %v579_v52 = vsel %vm517_vm1, %v578_v39, %v566_v30  ;;  %v588_v53 = vperm.slane %v584_v42, %v2039_v32  ;;  %v752_v39 = vpop.permute.xlu1 %751 }
 0x154   : > { %v703_v54 = vperm.slane %v699_v50, %v2039_v32  ;;  %v717_v55 = vrot.slane %v697_v47, 4  ;;  %v730_v56 = vsel %vm517_vm1, %v714_v48, %v729_v49  ;;  %v727_v57 = vrot.slane %v714_v48, 4 }
 0x155   : > { %v738_v58 = vperm.slane %v730_v56, %v2048_v45  ;;  %v583_v59 = vperm.slane %v579_v52, %v2039_v32  ;;  %v590_v60 = vsel %vm517_vm1, %v589_v46, %v570_v51  ;;  %v597_v61 = vrot.slane %v577_v38, 4 }
 0x156   : > { %v718_v62 = vsel %vm517_vm1, %v703_v54, %v717_v55  ;;  %v715_v63 = vrot.slane %v703_v54, 4  ;;  %v728_v0 = vsel %vm517_vm1, %v727_v57, %v708_v28  ;;  %v594_v1 = vperm.slane %v590_v60, %v2039_v32 }
 0x157   : > { %v726_v2 = vperm.slane %v718_v62, %v2048_v45  ;;  %v743_v3 = vrot.slane %v738_v58, 4  ;;  %v734_v4 = vperm.slane %v728_v0, %v2048_v45  ;;  %v598_v5 = vsel %vm517_vm1, %v583_v59, %v597_v61 }
 0x158   : > { %v716_v6 = vsel %vm517_vm1, %v715_v63, %v697_v47  ;;  %v606_v7 = vperm.slane %v598_v5, %v2048_v45  ;;  %v609_v8 = vrot.slane %v588_v53, 4  ;;  %v595_v9 = vrot.slane %v583_v59, 4 }
 0x159   : > { %v744_v10 = vsel %vm517_vm1, %v743_v3, %v726_v2  ;;  %v722_v11 = vperm.slane %v716_v6, %v2048_v45  ;;  %v739_v12 = vrot.slane %v734_v4, 4  ;;  %v745_v13 = vrot.slane %v726_v2, 4 }
 0x15a   : > { %1465 = vmatpush.xpose.msk.msrb.mxu0 %vm867_vm2, %v744_v10  ;;  %v610_v14 = vsel %vm517_vm1, %v594_v1, %v609_v8  ;;  %v607_v15 = vrot.slane %v594_v1, 4  ;;  %v625_v16 = vrot.slane %v606_v7, 4  ;;  %v596_v22 = vsel %vm517_vm1, %v595_v9, %v577_v38  ;;  %v749_v38 = vpop.permute.xlu0 %748 }
 0x15b   : > { %v740_v17 = vsel %vm517_vm1, %v739_v12, %v722_v11  ;;  %v746_v18 = vsel %vm517_vm1, %v738_v58, %v745_v13  ;;  %v618_v19 = vperm.slane %v610_v14, %v2048_v45  ;;  %v741_v20 = vrot.slane %v722_v11, 4 }
 0x15c   : > { %1461 = vmatpush.xpose.msk.msra.mxu3 %vm867_vm2, %v740_v17  ;;  %1467 = vmatpush.xpose.msk.msrb.mxu1 %vm867_vm2, %v746_v18  ;;  %v608_v23 = vsel %vm517_vm1, %v607_v15, %v588_v53  ;;  %v602_v29 = vperm.slane %v596_v22, %v2048_v45  ;;  %v759_v36 = vrot.slane %v2033_v21, 4  ;;  %v769_v37 = vrot.slane %v755_v35, 4 }
 0x15d   : > { %v623_v24 = vrot.slane %v618_v19, 4  ;;  %v742_v25 = vsel %vm517_vm1, %v734_v4, %v741_v20  ;;  %v614_v26 = vperm.slane %v608_v23, %v2048_v45  ;;  %v626_v27 = vsel %vm517_vm1, %v618_v19, %v625_v16 }
 0x15e   : > { %v621_v33 = vrot.slane %v602_v29, 4  ;;  %v771_v40 = vrot.slane %v749_v38, 4  ;;  %v757_v41 = vrot.slane %v752_v39, 4  ;;  %v760_v42 = vsel %vm517_vm1, %v752_v39, %v759_v36 }
 0x15f   : > { %v624_v28 = vsel %vm517_vm1, %v623_v24, %v606_v7  ;;  %v619_v30 = vrot.slane %v614_v26, 4  ;;  %1468 = vmatmul.msk.f32.vlgmr.msrb.gmra.mxu1 %vm867_vm2, %v626_v27  ;;  %v770_v43 = vsel %vm517_vm1, %v769_v37, %v749_v38  ;;  %v768_v44 = vperm.slane %v760_v42, %v2039_v32 }
 0x160   : > { %1463 = vmatpush.xpose.msk.msrb.mxu3 %vm867_vm2, %v742_v25  ;;  %1466 = vmatmul.msk.f32.vlgmr.msrb.gmra.mxu0 %vm867_vm2, %v624_v28  ;;  %v622_v34 = vsel %vm517_vm1, %v614_v26, %v621_v33  ;;  %v776_v46 = vperm.slane %v770_v43, %v2039_v32  ;;  %v758_v47 = vsel %vm517_vm1, %v757_v41, %v2033_v21 }
 0x161   : > { %v620_v31 = vsel %vm517_vm1, %v619_v30, %v602_v29  ;;  %v772_v48 = vsel %vm517_vm1, %v755_v35, %v771_v40  ;;  %v764_v49 = vperm.slane %v758_v47, %v2039_v32  ;;  %v795_v50 = vrot.slane %v768_v44, 4 }
 0x162   : > { %1462 = vmatmul.msk.f32.vlgmr.msra.gmra.mxu3 %vm867_vm2, %v620_v31  ;;  %v780_v51 = vperm.slane %v772_v48, %v2039_v32  ;;  %v781_v52 = vrot.slane %v776_v46, 4 }
 0x163   : > { %v783_v53 = vrot.slane %v764_v49, 4 }
 0x164   : > { %v782_v54 = vsel %vm517_vm1, %v781_v52, %v764_v49  ;;  %v793_v55 = vrot.slane %v780_v51, 4  ;;  %v796_v56 = vsel %vm517_vm1, %v780_v51, %v795_v50 }
 0x165   : > { %v788_v57 = vperm.slane %v782_v54, %v2048_v45  ;;  %v804_v58 = vperm.slane %v796_v56, %v2048_v45  ;;  %v784_v21 = vsel %vm517_vm1, %v776_v46, %v783_v53 }
 0x166   : > { %v794_v59 = vsel %vm517_vm1, %v793_v55, %v768_v44  ;;  %v792_v60 = vperm.slane %v784_v21, %v2048_v45 }
 0x167   : > { %v800_v61 = vperm.slane %v794_v59, %v2048_v45  ;;  %v805_v62 = vrot.slane %v788_v57, 4  ;;  %v811_v63 = vrot.slane %v804_v58, 4 }
 0x168   : > { %v807_v0 = vrot.slane %v792_v60, 4 }
 0x169   : > { %v809_v1 = vrot.slane %v800_v61, 4  ;;  %v812_v2 = vsel %vm517_vm1, 0.0, %v811_v63  ;;  %v824_v3 = vsel %vm517_vm1, %v811_v63, %v800_v61  ;;  %v806_v8 = vsel %vm517_vm1, 0.0, %v805_v62 }
 0x16a   : > { %1464 = vmatmul.msk.f32.vlgmr.msrb.gmra.mxu3 %vm867_vm2, %v622_v34  ;;  %v829_v4 = vrot.slane %v812_v2, 4  ;;  %v828_v5 = vperm.slane %v824_v3, %v2039_v32  ;;  %v808_v6 = vsel %vm517_vm1, 0.0, %v807_v0  ;;  %v813_v9 = vsel %vm517_vm1, %v807_v0, %v788_v57 }
 0x16b   : > { %v810_v7 = vsel %vm517_vm1, 0.0, %v809_v1  ;;  %v818_v10 = vrot.slane %v808_v6, 4  ;;  %v817_v11 = vperm.slane %v813_v9, %v2039_v32 }
 0x16c   : > { %v830_v12 = vsel %vm517_vm1, %v829_v4, %v810_v7  ;;  %v849_v13 = vrot.slane %v828_v5, 4 }
 0x16d   : > { %v834_v14 = vperm.slane %v830_v12, %v2039_v32  ;;  %v819_v15 = vsel %vm517_vm1, %v818_v10, %v806_v8  ;;  %v837_v16 = vrot.slane %v817_v11, 4 }
 0x16e   : > { %v823_v17 = vperm.slane %v819_v15, %v2039_v32 }
 0x16f   : > { %v847_v18 = vrot.slane %v834_v14, 4  ;;  %v850_v19 = vsel %vm517_vm1, %v834_v14, %v849_v13 }
 0x170   : > { %v858_v20 = vperm.slane %v850_v19, %v2048_v45  ;;  %v835_v22 = vrot.slane %v823_v17, 4  ;;  %v838_v24 = vsel %vm517_vm1, %v823_v17, %v837_v16 }
 0x171   : > { %v848_v23 = vsel %vm517_vm1, %v847_v18, %v828_v5  ;;  %v846_v26 = vperm.slane %v838_v24, %v2048_v45 }
 0x172   : > { %v854_v25 = vperm.slane %v848_v23, %v2048_v45  ;;  %v863_v27 = vrot.slane %v858_v20, 4  ;;  %v836_v28 = vsel %vm517_vm1, %v835_v22, %v817_v11 }
 0x173   : > { %v842_v29 = vperm.slane %v836_v28, %v2048_v45  ;;  %v865_v33 = vrot.slane %v846_v26, 4 }
 0x174   : > { %v859_v30 = vrot.slane %v854_v25, 4  ;;  %v864_v31 = vsel %vm517_vm1, %v863_v27, %v846_v26 }
 0x175   : > { %1072 = vmatpush.msra.mxu0 %v864_v31  ;;  %v861_v35 = vrot.slane %v842_v29, 4  ;;  %v866_v36 = vsel %vm517_vm1, %v858_v20, %v865_v33 }
 0x176   : > { %v860_v34 = vsel %vm517_vm1, %v859_v30, %v842_v29  ;;  %1095 = vmatpush.msra.mxu1 %v866_v36 }
 0x177   : > { %1026 = vmatpush.msrb.mxu2 %v860_v34  ;;  %v862_v37 = vsel %vm517_vm1, %v854_v25, %v861_v35 }
 0x178   : > { %1049 = vmatpush.msra.mxu3 %v862_v37 }
 0x1dc   : > { %v969_v40 = vpop.f32.mrf.mxu1 }
 0x1dd   : > { %v943_v38 = vpop.f32.mrf.mxu0  ;;  %v981_v42 = vsel %vm867_vm2, %v969_v40, -inf }
 0x1de   : > { %v978_v39 = vsel %vm867_vm2, %v943_v38, -inf }
 0x1df   : > { %979 = vmax.xlane.f32.xlu2 %v978_v39 }
 0x1e5   : > { %v891_v41 = vpop.f32.mrf.mxu3 }
 0x1e6   : > { %v972_v43 = vsel %vm867_vm2, %v891_v41, -inf }
 0x1e7   : > { %982 = vmax.xlane.f32.xlu2 %v981_v42  ;;  %973 = vmax.xlane.f32.xlu0 %v972_v43 }
 0x1ed   : > { %v917_v44 = vpop.f32.mrf.mxu3 }
 0x1ee   : > { %v975_v46 = vsel %vm867_vm2, %v917_v44, -inf }
 0x1ef   : > { %976 = vmax.xlane.f32.xlu1 %v975_v46 }
 0x252   : > { %v980_v47 = vpop.xlane.xlu2 %979 }
 0x253   : > { %v986_v48 = vsub.f32 %v943_v38, %v980_v47 }
 0x255   : > { %v992_v49 = vmul.f32 1.442695, %v986_v48 }
 0x257   : > { %1579 = vpow2.f32 %v992_v49 }
 0x25a   : > { %v983_v50 = vpop.xlane.xlu2 %982  ;;  %v974_v51 = vpop.xlane.xlu0 %973 }
 0x25b   : > { %v987_v52 = vsub.f32 %v969_v40, %v983_v50  ;;  %v984_v53 = vsub.f32 %v891_v41, %v974_v51 }
 0x25d   : > { %v1580_v54 = vpop.eup %1579  ;;  %v994_v55 = vmul.f32 1.442695, %v987_v52  ;;  %v988_v56 = vmul.f32 1.442695, %v984_v53 }
 0x25e   : > { %1471 = vmatmul.msk.f32.vlgmr.msra.gmra.mxu0 %vm867_vm2, %v1580_v54  ;;  %v1002_v57 = vsel %vm867_vm2, %v1580_v54, 0.0 }
 0x25f   : > { %1581 = vpow2.f32 %v994_v55  ;;  %1003 = vadd.xlane.f32.xlu0 %v1002_v57 }
 0x260   : > { %1583 = vpow2.f32 %v988_v56 }
 0x262   : > { %v977_v58 = vpop.xlane.xlu1 %976 }
 0x263   : > { %v985_v21 = vsub.f32 %v917_v44, %v977_v58 }
 0x265   : > { %v1582_v59 = vpop.eup %1581  ;;  %v990_v60 = vmul.f32 1.442695, %v985_v21 }
 0x266   : > { %v1584_v61 = vpop.eup %1583  ;;  %1472 = vmatmul.msk.f32.vlgmr.msra.gmra.mxu1 %vm867_vm2, %v1582_v59  ;;  %v1005_v62 = vsel %vm867_vm2, %v1582_v59, 0.0 }
 0x267   : > { %1585 = vpow2.f32 %v990_v60  ;;  %1469 = vmatmul.msk.f32.vlgmr.msrb.gmra.mxu2 %vm867_vm2, %v1584_v61  ;;  %1006 = vadd.xlane.f32.xlu2 %v1005_v62  ;;  %v996_v63 = vsel %vm867_vm2, %v1584_v61, 0.0 }
 0x268   : > { %997 = vadd.xlane.f32.xlu1 %v996_v63 }
 0x26d   : > { %v1586_v0 = vpop.eup %1585 }
 0x26e   : > { %1470 = vmatmul.msk.f32.vlgmr.msra.gmra.mxu3 %vm867_vm2, %v1586_v0  ;;  %v999_v1 = vsel %vm867_vm2, %v1586_v0, 0.0 }
 0x26f   : > { %1000 = vadd.xlane.f32.xlu0 %v999_v1 }
 0x2d2   : > { %v1004_v2 = vpop.xlane.xlu0 %1003 }
 0x2d3   : > { %1587 = vrcp.f32 %v1004_v2  ;;  %v1137_v11 = vand.u32 2147483647, %v1004_v2  ;;  %v1139_v12 = vand.u32 2147483648, %v1004_v2  ;;  %vm1133_vm4 = vweird.f32 %v1004_v2 }
 0x2d5   : > { %vm1138_vm6 = vcmp.eq.f32.partialorder %v1137_v11, 8.507059e+37  ;;  %v1140_v20 = vor.u32 1.1754944e-38, %v1139_v12 }
 0x2d9   : > { %v1588_v3 = vpop.eup %1587 }
 0x2da   : > { %v1129_v4 = vmul.f32 %v1588_v3, %v1004_v2  ;;  %v1007_v5 = vpop.xlane.xlu2 %1006  ;;  %vm1134_vm3 = vweird.f32 %v1588_v3 }
 0x2db   : > { %1589 = vrcp.f32 %v1007_v5  ;;  %v998_v6 = vpop.xlane.xlu1 %997  ;;  %vm1135_vm5 = vmor %vm1133_vm4, %vm1134_vm3  ;;  %v1153_v23 = vand.u32 2147483648, %v1007_v5  ;;  %vm1147_vm9 = vweird.f32 %v1007_v5  ;;  %v1151_v29 = vand.u32 2147483647, %v1007_v5  ;;  %v1074_v31 = vpop.f32.mrf.mxu0 }
 0x2dc   : > { %v1130_v7 = vsub.f32 1.0, %v1129_v4  ;;  %1591 = vrcp.f32 %v998_v6  ;;  %v1111_v24 = vand.u32 2147483648, %v998_v6  ;;  %v1109_v27 = vand.u32 2147483647, %v998_v6 }
 0x2dd   : > { %vm1105_vm11 = vweird.f32 %v998_v6  ;;  %v1154_v39 = vor.u32 1.1754944e-38, %v1153_v23  ;;  %vm1152_vm14 = vcmp.eq.f32.partialorder %v1151_v29, 8.507059e+37 }
 0x2de   : > { %v1131_v8 = vmul.f32 %v1588_v3, %v1130_v7  ;;  %v1112_v38 = vor.u32 1.1754944e-38, %v1111_v24  ;;  %vm1110_vm13 = vcmp.eq.f32.partialorder %v1109_v27, 8.507059e+37 }
 0x2e0   : > { %v1132_v9 = vadd.f32 %v1588_v3, %v1131_v8 }
 0x2e1   : > { %v1590_v10 = vpop.eup %1589 }
 0x2e2   : > { %v1592_v13 = vpop.eup %1591  ;;  %v1143_v14 = vmul.f32 %v1590_v10, %v1007_v5  ;;  %v1001_v15 = vpop.xlane.xlu0 %1000  ;;  %v1136_v18 = vsel %vm1135_vm5, %v1588_v3, %v1132_v9  ;;  %vm1148_vm7 = vweird.f32 %v1590_v10 }
 0x2e3   : > { %v1101_v16 = vmul.f32 %v1592_v13, %v998_v6  ;;  %1593 = vrcp.f32 %v1001_v15  ;;  %v1141_v25 = vsel %vm1138_vm6, %v1140_v20, %v1136_v18  ;;  %vm1106_vm8 = vweird.f32 %v1592_v13  ;;  %vm2184_vm10 = vmor %vm1147_vm9, %vm1148_vm7  ;;  %v1097_v51 = vpop.f32.mrf.mxu1 }
 0x2e4   : > { %v1144_v17 = vsub.f32 1.0, %v1143_v14  ;;  %v1158_v35 = vmul.f32 %v1141_v25, %v1074_v31  ;;  %vm1107_vm12 = vmor %vm1105_vm11, %vm1106_vm8  ;;  %v1125_v47 = vand.u32 2147483648, %v1001_v15  ;;  %v1123_v50 = vand.u32 2147483647, %v1001_v15 }
 0x2e5   : > { %v1102_v19 = vsub.f32 1.0, %v1101_v16  ;;  %vm1119_vm3 = vweird.f32 %v1001_v15  ;;  %vm1283_vm6 = vcmask 130048   ;;  %vm1285_vm7 = vcmask 195584  }
 0x2e6   : > { %v1145_v22 = vmul.f32 %v1590_v10, %v1144_v17  ;;  %v1160_v48 = vrot.slane %v1158_v35, 4  ;;  %v1126_v56 = vor.u32 1.1754944e-38, %v1125_v47  ;;  %vm1124_vm5 = vcmp.eq.f32.partialorder %v1123_v50, 8.507059e+37 }
 0x2e7   : > { %v1103_v26 = vmul.f32 %v1592_v13, %v1102_v19 }
 0x2e8   : > { %v1146_v28 = vadd.f32 %v1590_v10, %v1145_v22 }
 0x2e9   : > { %v1594_v30 = vpop.eup %1593  ;;  %v1104_v34 = vadd.f32 %v1592_v13, %v1103_v26 }
 0x2ea   : > { %v1115_v36 = vmul.f32 %v1594_v30, %v1001_v15  ;;  %v1150_v37 = vsel %vm2184_vm10, %v1590_v10, %v1146_v28  ;;  %v1028_v42 = vpop.f32.mrf.mxu2  ;;  %vm1120_vm15 = vweird.f32 %v1594_v30 }
 0x2eb   : > { %v1108_v40 = vsel %vm1107_vm12, %v1592_v13, %v1104_v34  ;;  %v1155_v44 = vsel %vm1152_vm14, %v1154_v39, %v1150_v37  ;;  %vm1121_vm4 = vmor %vm1119_vm3, %vm1120_vm15 }
 0x2ec   : > { %v1116_v41 = vsub.f32 1.0, %v1115_v36  ;;  %v1113_v43 = vsel %vm1110_vm13, %v1112_v38, %v1108_v40  ;;  %v1159_v53 = vmul.f32 %v1155_v44, %v1097_v51 }
 0x2ed   : > { %v1156_v46 = vmul.f32 %v1113_v43, %v1028_v42 }
 0x2ee   : > { %v1117_v49 = vmul.f32 %v1594_v30, %v1116_v41  ;;  %v1172_v61 = vrot.slane %v1159_v53, 4 }
 0x2ef   : > { %v1162_v52 = vrot.slane %v1156_v46, 4  ;;  %v1161_v54 = vsel %vm517_vm1, %v1160_v48, %v1156_v46 }
 0x2f0   : > { %v1118_v55 = vadd.f32 %v1594_v30, %v1117_v49  ;;  %v1167_v21 = vperm.slane %v1161_v54, %v2039_v32 }
 0x2f1   : > { %v1163_v57 = vsel %vm517_vm1, %v1158_v35, %v1162_v52  ;;  %v1051_v59 = vpop.f32.mrf.mxu3 }
 0x2f2   : > { %v1122_v58 = vsel %vm1121_vm4, %v1594_v30, %v1118_v55  ;;  %v1171_v63 = vperm.slane %v1163_v57, %v2039_v32  ;;  %v1186_v2 = vrot.slane %v1167_v21, 4  ;;  %v1290_v57 = vld [vmem:[#allocation10 + $0x18] sm:$0xff] }
 0x2f3   : > { %v1127_v60 = vsel %vm1124_vm5, %v1126_v56, %v1122_v58  ;;  %v1289_v58 = vld [vmem:[#allocation10 + $0x10] sm:$0xff]  ;;  %1309 = vmatpush.msra.mxu2 %v1290_v57 }
 0x2f4   : > { %v1157_v62 = vmul.f32 %v1127_v60, %v1051_v59  ;;  %v1198_v5 = vrot.slane %v1171_v63, 4 }
 0x2f5   : > { %1310 = vmatpush.msra.mxu2 %v1289_v58 }
 0x2f6   : > { %v1173_v0 = vsel %vm517_vm1, %v1172_v61, %v1157_v62  ;;  %v1174_v1 = vrot.slane %v1157_v62, 4 }
 0x2f7   : > { %v1179_v3 = vperm.slane %v1173_v0, %v2039_v32 }
 0x2f8   : > { %v1175_v4 = vsel %vm517_vm1, %v1159_v53, %v1174_v1  ;;  %v1578_v1 = vld [vmem:[%s2279_s8] ss:$0 sm:$0xff] }
 0x2f9   : > { %v1183_v6 = vperm.slane %v1175_v4, %v2039_v32  ;;  %v1184_v7 = vrot.slane %v1179_v3, 4  ;;  %v1187_v8 = vsel %vm517_vm1, %v1179_v3, %v1186_v2 }
 0x2fa   : > { %v1195_v9 = vperm.slane %v1187_v8, %v2048_v45 }
 0x2fb   : > { %v1185_v10 = vsel %vm517_vm1, %v1184_v7, %v1167_v21  ;;  %v1196_v11 = vrot.slane %v1183_v6, 4  ;;  %v1199_v12 = vsel %vm517_vm1, %v1183_v6, %v1198_v5  ;;  %v1287_v21 = vld [vmem:[#allocation10] sm:$0xff] }
 0x2fc   : > { %v1191_v13 = vperm.slane %v1185_v10, %v2048_v45  ;;  %v1207_v14 = vperm.slane %v1199_v12, %v2048_v45  ;;  %v1210_v15 = vrot.slane %v1195_v9, 4 }
 0x2fd   : > { %v1197_v16 = vsel %vm517_vm1, %v1196_v11, %v1171_v63 }
 0x2fe   : > { %v1203_v17 = vperm.slane %v1197_v16, %v2048_v45  ;;  %v1208_v18 = vrot.slane %v1191_v13, 4  ;;  %v1211_v19 = vsel %vm517_vm1, 0.0, %v1210_v15  ;;  %v1214_v20 = vrot.slane %v1207_v14, 4 }
 0x2ff   : > { %v1216_v22 = vsel %vm517_vm1, %v1210_v15, %v1191_v13  ;;  %v1221_v23 = vrot.slane %v1211_v19, 4 }
 0x300   : > { %v1215_v24 = vsel %vm517_vm1, 0.0, %v1214_v20  ;;  %v1209_v25 = vsel %vm517_vm1, 0.0, %v1208_v18  ;;  %v1212_v26 = vrot.slane %v1203_v17, 4  ;;  %v1220_v27 = vperm.slane %v1216_v22, %v2039_v32 }
 0x301   : > { %v1232_v28 = vrot.slane %v1215_v24, 4  ;;  %v1222_v29 = vsel %vm517_vm1, %v1221_v23, %v1209_v25  ;;  %v1227_v30 = vsel %vm517_vm1, %v1214_v20, %v1203_v17 }
 0x302   : > { %v1213_v31 = vsel %vm517_vm1, 0.0, %v1212_v26  ;;  %v1226_v33 = vperm.slane %v1222_v29, %v2039_v32  ;;  %v1231_v34 = vperm.slane %v1227_v30, %v2039_v32  ;;  %v1240_v35 = vrot.slane %v1220_v27, 4 }
 0x303   : > { %v1233_v36 = vsel %vm517_vm1, %v1232_v28, %v1213_v31 }
 0x304   : > { %v1237_v37 = vperm.slane %v1233_v36, %v2039_v32  ;;  %v1241_v38 = vsel %vm517_vm1, %v1226_v33, %v1240_v35  ;;  %v1252_v39 = vrot.slane %v1231_v34, 4  ;;  %v1238_v40 = vrot.slane %v1226_v33, 4 }
 0x305   : > { %v1249_v41 = vperm.slane %v1241_v38, %v2048_v45 }
 0x306   : > { %v1253_v42 = vsel %vm517_vm1, %v1237_v37, %v1252_v39  ;;  %v1239_v43 = vsel %vm517_vm1, %v1238_v40, %v1220_v27  ;;  %v1250_v44 = vrot.slane %v1237_v37, 4 }
 0x307   : > { %v1261_v46 = vperm.slane %v1253_v42, %v2048_v45  ;;  %v1268_v47 = vrot.slane %v1249_v41, 4  ;;  %v1245_v48 = vperm.slane %v1239_v43, %v2048_v45 }
 0x308   : > { %v1251_v49 = vsel %vm517_vm1, %v1250_v44, %v1231_v34 }
 0x309   : > { %v1269_v32 = vsel %vm517_vm1, %v1261_v46, %v1268_v47  ;;  %v1266_v50 = vrot.slane %v1261_v46, 4  ;;  %v1257_v51 = vperm.slane %v1251_v49, %v2048_v45  ;;  %v1264_v52 = vrot.slane %v1245_v48, 4  ;;  %v1288_v45 = vld [vmem:[#allocation10 + $0x8] sm:$0xff] }
 0x30a   : > { %1279 = vrot.lane.b32.xlu0 %v1269_v32, %s1832_s24  ;;  %1311 = vmatpush.msra.mxu2 %v1288_v45 }
 0x30b   : > { %v1267_v53 = vsel %vm517_vm1, %v1266_v50, %v1249_v41  ;;  %v1262_v54 = vrot.slane %v1257_v51, 4  ;;  %v1265_v55 = vsel %vm517_vm1, %v1257_v51, %v1264_v52 }
 0x30c   : > { %1275 = vrot.lane.b32.xlu2 %v1267_v53, %s1833_s15  ;;  %1271 = vrot.lane.b32.xlu1 %v1265_v55, %s1834_s14 }
 0x30d   : > { %v1263_v56 = vsel %vm517_vm1, %v1262_v54, %v1245_v48  ;;  %1312 = vmatpush.msra.mxu2 %v1287_v21 }
 0x366   : > { %v1276_v60 = vpop.permute.xlu2 %1275 }
 0x37c   : > { %v1280_v62 = vpop.permute.xlu0 %1279 }
 0x37e   : > { %v1272_v59 = vpop.permute.xlu1 %1271 }
 0x37f   : > { %v1282_v61 = vsel %vm867_vm2, %v1263_v56, %v1272_v59 }
 0x380   : > { %v1284_v63 = vsel %vm1283_vm6, %v1282_v61, %v1276_v60 }
 0x381   : > { %v1286_v0 = vsel %vm1285_vm7, %v1284_v63, %v1280_v62 }
 0x382   : > { %1473 = vmatmul.msk.f32.vlgmr.msra.gmra.mxu2 %vm428_vm0, %v1286_v0 }
 0x405   : > { %v1314_v2 = vpop.f32.mrf.mxu2 }
 0x406   : > { %v1315_v3 = vadd.f32 %v1578_v1, %v1314_v2 }
 0x408   : > { %1317 = vst.msk [vmem:[%s415_s23] sm:$0xff] %vm428_vm0, %v1315_v3 }
 0x409   : > { %1772 = shalt.err (!%p1769_p9)
}
 0x40a   : > { %1496 = dma.vmem_to_hbm [thread:$0]  (%p1972_p4), %s1332_s28, 128, %s1334_s22, %s1319_s16  }
 0x40b PF: > { %s1345_s29 = sand.u32 1, %s1807_s30   ;;  %p2298_p10 = scmp.ge.s32.totalorder %s1819_s12, 2 }
 0x40c   : > { %s1346_s5 = scalar_lea.sflag [#allocation4], %s1345_s29 }
 0x40d   : > { %p1516_p13 = pnand %p2298_p10, %p1976_p6 }
 0x40f   : > { %p1517_p11 = pneg %p1516_p13 }
 0x411   : > { %1802 = dma.done.wait (%p1517_p11), %s1346_s5, 128  }
 0x412   : > { %1804 = vsyncadd (%p1517_p11), %s1346_s5, 4294967168  ;;  %p24_p0 = scmp.ge.s32.totalorder %s1946_s25, 4   ;;  %s2299_s30 = smov %s1811_s10 }
 0x413   : > { %s2300_s10 = smov %s1815_s11  ;;  %s2301_s11 = smov %s1957_s26 }
 0x414   : > { %s2302_s12 = smov %s1946_s25  ;;  %26 = sbr.rel (!%p24_p0) target bundleno = 12 (0xc), region = 117 }
 0x419   :  { %1352 = vsyncpa [#allocation3], 1 }
 0x41a   :  { %1354 = vsyncpa [#allocation3 + $0x1], 1 }
 0x41b   :  { %1355 = vsyncpa [#allocation6], 1 }
 0x41c   :  { %1356 = vsyncpa [#allocation9], 1 }
 0x41d   :  { %1357 = vsyncpa [#allocation4], 1 }
 0x41e   :  { %1359 = vsyncpa [#allocation4 + $0x1], 1 }

</bundles_post_ra>
